<compile_context>
chip_gen: v6e
topology: v6e:2x2x1
jax: 0.10.0
libtpu: 0.0.40
codegen_flags: <defaults>
</compile_context>

<pallas_src>
import jax
import jax.numpy as jnp
from jax import lax
from jax.experimental import pallas as pl
from jax.experimental.pallas import tpu as pltpu


_CHUNK_ROWS = 128  # packed rows per inner sub-chunk (vreg-friendly slab)


def mlp_kernel(x_ref, w1_ref, b1_ref, w2_ref, b2_ref, w3_ref, b3_ref, o_ref):
    tile_rows = x_ref.shape[0]
    n_chunks = tile_rows // _CHUNK_ROWS  # static

    # Weights / biases loaded once per grid step.  (1, N) biases are NOT
    # broadcast to full tiles -- the adds below broadcast implicitly from a
    # single sublane-broadcast vreg.
    w1 = w1_ref[...]          # bf16 (pK, pH), block-diagonal
    w2 = w2_ref[...]          # bf16 (pH, pH), block-diagonal
    w3 = w3_ref[...]          # bf16 (pH, pH), block-diagonal
    b1 = b1_ref[...]          # f32 (1, pH)
    b2 = b2_ref[...]          # f32 (1, pH)
    b3 = b3_ref[...]          # f32 (1, pH)

    def chunk(c, carry):
        r0 = pl.multiple_of(c * _CHUNK_ROWS, _CHUNK_ROWS)
        x = x_ref[pl.ds(r0, _CHUNK_ROWS), :]                 # bf16, lane-dense

        # fc1 -> dropout (identity in eval) -> relu
        h = jnp.dot(x, w1, preferred_element_type=jnp.float32) + b1
        h = jnp.maximum(h, 0.0)

        # 4x [fc2 -> dropout(identity) -> relu -> fc3]; checkpointing has no
        # forward effect.  bf16 MXU inputs, f32 accumulation + elementwise.
        def fc(_, h):
            t = jnp.dot(h.astype(jnp.bfloat16), w2,
                        preferred_element_type=jnp.float32) + b2
            t = jnp.maximum(t, 0.0)
            t = jnp.dot(t.astype(jnp.bfloat16), w3,
                        preferred_element_type=jnp.float32) + b3
            return t

        h = lax.fori_loop(0, 4, fc, h, unroll=True)
        o_ref[pl.ds(r0, _CHUNK_ROWS), :] = h.astype(o_ref.dtype)
        return carry

    lax.fori_loop(0, n_chunks, chunk, 0, unroll=True)


def _round_up(a, m):
    return pl.cdiv(a, m) * m


def _choose_pack(input_dim, hidden):
    # Largest pack factor p such that p*input_dim and p*hidden are lane-dense
    # multiples of 128; fall back to 1 (unpacked) if none fits.
    for p in (8, 4, 2, 1):
        if (p * input_dim) % 128 == 0 and (p * hidden) % 128 == 0:
            return p
    return 1


def checkpointed_mlp_forward(x, w1, b1, w2, b2, w3, b3, *, tile_rows=512):
    batch, input_dim = x.shape
    hidden = w1.shape[1]
    out_dim = w3.shape[1]
    assert w1.shape == (input_dim, hidden)
    assert w2.shape == (hidden, hidden)
    assert w3.shape == (hidden, out_dim)
    assert out_dim == hidden, "4x fc2/fc3 reuse requires output_dim == hidden_dim"
    assert tile_rows % _CHUNK_ROWS == 0 and tile_rows >= _CHUNK_ROWS

    pack = _choose_pack(input_dim, hidden)
    pK, pH, pO = pack * input_dim, pack * hidden, pack * out_dim

    # Block-diagonal (pack copies) weights: packed_x @ blockdiag(W) computes
    # `pack` independent row-matmuls at once.  bf16 MXU inputs, f32 accumulate.
    eye = jnp.eye(pack, dtype=jnp.float32)
    w1p = jnp.kron(eye, w1.astype(jnp.float32)).astype(jnp.bfloat16)
    w2p = jnp.kron(eye, w2.astype(jnp.float32)).astype(jnp.bfloat16)
    w3p = jnp.kron(eye, w3.astype(jnp.float32)).astype(jnp.bfloat16)
    b1p = jnp.tile(b1.astype(jnp.float32), pack).reshape(1, pH)
    b2p = jnp.tile(b2.astype(jnp.float32), pack).reshape(1, pH)
    b3p = jnp.tile(b3.astype(jnp.float32), pack).reshape(1, pO)

    rows = pl.cdiv(batch, pack)                               # packed rows needed
    tile = min(tile_rows, _round_up(rows, _CHUNK_ROWS))       # multiple of chunk
    rows_pad = _round_up(rows, tile)                          # even grid split
    batch_pad = rows_pad * pack

    xb = x.astype(jnp.bfloat16)  # halve streamed input bytes into the kernel
    if batch_pad != batch:
        # Fuses with the bf16 cast into one pass; padded rows are
        # row-independent garbage sliced off below.
        # TODO(synk): for huge batches, a scalar-prefetched valid-row count
        # with an in-kernel ragged last tile would avoid this pad entirely.
        xb = jnp.pad(xb, ((0, batch_pad - batch), (0, 0)))
    xp = xb.reshape(rows_pad, pK)  # row-major: `pack` batch rows per vector row

    num_blocks = rows_pad // tile
    flops_row = 2 * pK * pH + 4 * 2 * (pH * pH + pH * pO)
    cost = pl.CostEstimate(
        flops=int(flops_row) * int(rows_pad),
        transcendentals=0,
        bytes_accessed=int(xp.size * 2 + rows_pad * pO * 4
                           + (w1p.size + w2p.size + w3p.size) * 2
                           + (b1p.size + b2p.size + b3p.size) * 4),
    )

    out = pl.pallas_call(
        mlp_kernel,
        out_shape=jax.ShapeDtypeStruct((rows_pad, pO), jnp.float32),
        grid_spec=pltpu.PrefetchScalarGridSpec(
            num_scalar_prefetch=0,
            grid=(num_blocks,),
            in_specs=[
                pl.BlockSpec((tile, pK), lambda i: (i, 0)),   # packed x tile
                pl.BlockSpec((pK, pH), lambda i: (0, 0)),     # w1 (resident)
                pl.BlockSpec((1, pH), lambda i: (0, 0)),      # b1
                pl.BlockSpec((pH, pH), lambda i: (0, 0)),     # w2 (resident)
                pl.BlockSpec((1, pH), lambda i: (0, 0)),      # b2
                pl.BlockSpec((pH, pO), lambda i: (0, 0)),     # w3 (resident)
                pl.BlockSpec((1, pO), lambda i: (0, 0)),      # b3
            ],
            out_specs=pl.BlockSpec((tile, pO), lambda i: (i, 0)),
        ),
        compiler_params=pltpu.CompilerParams(
            dimension_semantics=("parallel",),
        ),
        cost_estimate=cost,
    )(xp, w1p, b1p, w2p, b2p, w3p, b3p)

    return out.reshape(batch_pad, out_dim)[:batch]


def reference_forward_f32(x, w1, b1, w2, b2, w3, b3):
    h = jnp.maximum(x @ w1 + b1, 0.0)
    for _ in range(4):
        h = jnp.maximum(h @ w2 + b2, 0.0) @ w3 + b3
    return h


def reference_forward_bf16(x, w1, b1, w2, b2, w3, b3):
    # Same bf16-input / f32-accumulate scheme the kernel uses.
    w1b, w2b, w3b = (w.astype(jnp.bfloat16) for w in (w1, w2, w3))
    h = jnp.dot(x.astype(jnp.bfloat16), w1b,
                preferred_element_type=jnp.float32) + b1
    h = jnp.maximum(h, 0.0)
    for _ in range(4):
        t = jnp.dot(h.astype(jnp.bfloat16), w2b,
                    preferred_element_type=jnp.float32) + b2
        t = jnp.maximum(t, 0.0)
        h = jnp.dot(t.astype(jnp.bfloat16), w3b,
                    preferred_element_type=jnp.float32) + b3
    return h


if __name__ == "__main__":
    # Small shapes consistent with the module: input_dim=16,
    # hidden_dim=output_dim=32 (output must equal hidden for the 4x fc stack).
    # batch=300 exercises lane packing (pack=8) and the ragged-batch padding.
    batch, input_dim, hidden_dim, output_dim = 300, 16, 32, 32

    key = jax.random.PRNGKey(0)
    kx, k1, k2, k3, kb1, kb2, kb3 = jax.random.split(key, 7)

    x = jax.random.normal(kx, (batch, input_dim), dtype=jnp.float32)

    # Deterministic parameter init (uniform ~ PyTorch nn.Linear default scale).
    def init_linear(kw, kb, fan_in, fan_out):
        bound = 1.0 / jnp.sqrt(jnp.float32(fan_in))
        w = jax.random.uniform(kw, (fan_in, fan_out), jnp.float32, -bound, bound)
        b = jax.random.uniform(kb, (fan_out,), jnp.float32, -bound, bound)
        return w, b

    w1, b1 = init_linear(k1, kb1, input_dim, hidden_dim)
    w2, b2 = init_linear(k2, kb2, hidden_dim, hidden_dim)
    w3, b3 = init_linear(k3, kb3, hidden_dim, output_dim)

    out = checkpointed_mlp_forward(x, w1, b1, w2, b2, w3, b3)
    out = jax.block_until_ready(out)
    assert out.shape == (batch, output_dim)

    # Tight check against a reference using the same bf16-input MXU scheme
    # (lane packing with block-diagonal weights is numerically equivalent).
    ref_bf16 = reference_forward_bf16(x, w1, b1, w2, b2, w3, b3)
    assert jnp.allclose(out, ref_bf16, atol=5e-3, rtol=5e-3)

    # Loose check against the full-f32 module semantics (bf16 MXU inputs
    # introduce small, bounded error).
    ref_f32 = reference_forward_f32(x, w1, b1, w2, b2, w3, b3)
    assert jnp.allclose(out, ref_f32, atol=7e-2, rtol=7e-2)

    print("KERNEL_OK")
</pallas_src>

<mosaic_0001>
module attributes {stable_mosaic.version = 11 : i64} {
  func.func @mlp_kernel(%arg0: i32, %arg1: memref<128x128xbf16, #tpu.memory_space<vmem>>, %arg2: memref<128x256xbf16, #tpu.memory_space<vmem>>, %arg3: memref<1x256xf32, #tpu.memory_space<vmem>>, %arg4: memref<256x256xbf16, #tpu.memory_space<vmem>>, %arg5: memref<1x256xf32, #tpu.memory_space<vmem>>, %arg6: memref<256x256xbf16, #tpu.memory_space<vmem>>, %arg7: memref<1x256xf32, #tpu.memory_space<vmem>>, %arg8: memref<128x256xf32, #tpu.memory_space<vmem>>) attributes {dimension_semantics = [#tpu.dimension_semantics<parallel>], iteration_bounds = array<i64: 1>, scalar_prefetch = 0 : i64, scratch_operands = 0 : i64, tpu.core_type = #tpu.core_type<tc>, window_params = [{transform_indices = @transform_0, window_bounds = array<i64: 128, 128>}, {pipeline_mode = #tpu.pipeline_mode<synchronous>, transform_indices = @transform_1, window_bounds = array<i64: 128, 256>}, {pipeline_mode = #tpu.pipeline_mode<synchronous>, transform_indices = @transform_2, window_bounds = array<i64: 1, 256>}, {pipeline_mode = #tpu.pipeline_mode<synchronous>, transform_indices = @transform_3, window_bounds = array<i64: 256, 256>}, {pipeline_mode = #tpu.pipeline_mode<synchronous>, transform_indices = @transform_4, window_bounds = array<i64: 1, 256>}, {pipeline_mode = #tpu.pipeline_mode<synchronous>, transform_indices = @transform_5, window_bounds = array<i64: 256, 256>}, {pipeline_mode = #tpu.pipeline_mode<synchronous>, transform_indices = @transform_6, window_bounds = array<i64: 1, 256>}, {transform_indices = @transform_7, window_bounds = array<i64: 128, 256>}]} {
    %c0 = arith.constant 0 : index
    %c0_0 = arith.constant 0 : index
    %0 = vector.load %arg2[%c0, %c0_0] : memref<128x256xbf16, #tpu.memory_space<vmem>>, vector<128x256xbf16>
    %c0_1 = arith.constant 0 : index
    %c0_2 = arith.constant 0 : index
    %1 = vector.load %arg4[%c0_1, %c0_2] : memref<256x256xbf16, #tpu.memory_space<vmem>>, vector<256x256xbf16>
    %c0_3 = arith.constant 0 : index
    %c0_4 = arith.constant 0 : index
    %2 = vector.load %arg6[%c0_3, %c0_4] : memref<256x256xbf16, #tpu.memory_space<vmem>>, vector<256x256xbf16>
    %c0_5 = arith.constant 0 : index
    %c0_6 = arith.constant 0 : index
    %3 = vector.load %arg3[%c0_5, %c0_6] : memref<1x256xf32, #tpu.memory_space<vmem>>, vector<1x256xf32>
    %c0_7 = arith.constant 0 : index
    %c0_8 = arith.constant 0 : index
    %4 = vector.load %arg5[%c0_7, %c0_8] : memref<1x256xf32, #tpu.memory_space<vmem>>, vector<1x256xf32>
    %c0_9 = arith.constant 0 : index
    %c0_10 = arith.constant 0 : index
    %5 = vector.load %arg7[%c0_9, %c0_10] : memref<1x256xf32, #tpu.memory_space<vmem>>, vector<1x256xf32>
    %c0_i32 = arith.constant 0 : i32
    %c128_i32 = arith.constant 128 : i32
    %6 = arith.muli %c0_i32, %c128_i32 : i32
    %7 = tpu.assume_multiple %6, 128 : i32
    %8 = arith.index_cast %7 : i32 to index
    %c0_11 = arith.constant 0 : index
    %9 = vector.load %arg1[%8, %c0_11] : memref<128x128xbf16, #tpu.memory_space<vmem>>, vector<128x128xbf16>
    %cst = arith.constant dense<0.000000e+00> : vector<128x256xf32>
    %10 = tpu.matmul %9, %0, %cst {dimension_numbers = #tpu.dot_dimension_numbers<[1], [0], [0], [1], [0, 0, 1, 1], [], []>} : vector<128x128xbf16>, vector<128x256xbf16>, vector<128x256xf32> -> vector<128x256xf32>
    %11 = vector.broadcast %3 : vector<1x256xf32> to vector<128x256xf32>
    %12 = arith.addf %10, %11 : vector<128x256xf32>
    %cst_12 = arith.constant 0.000000e+00 : f32
    %13 = vector.broadcast %cst_12 : f32 to vector<128x256xf32>
    %14 = arith.maximumf %12, %13 : vector<128x256xf32>
    %c0_i32_13 = arith.constant 0 : i32
    %15 = arith.truncf %14 : vector<128x256xf32> to vector<128x256xbf16>
    %cst_14 = arith.constant dense<0.000000e+00> : vector<128x256xf32>
    %16 = tpu.matmul %15, %1, %cst_14 {dimension_numbers = #tpu.dot_dimension_numbers<[1], [0], [0], [1], [0, 0, 1, 1], [], []>} : vector<128x256xbf16>, vector<256x256xbf16>, vector<128x256xf32> -> vector<128x256xf32>
    %17 = vector.broadcast %4 : vector<1x256xf32> to vector<128x256xf32>
    %18 = arith.addf %16, %17 : vector<128x256xf32>
    %cst_15 = arith.constant 0.000000e+00 : f32
    %19 = vector.broadcast %cst_15 : f32 to vector<128x256xf32>
    %20 = arith.maximumf %18, %19 : vector<128x256xf32>
    %21 = arith.truncf %20 : vector<128x256xf32> to vector<128x256xbf16>
    %cst_16 = arith.constant dense<0.000000e+00> : vector<128x256xf32>
    %22 = tpu.matmul %21, %2, %cst_16 {dimension_numbers = #tpu.dot_dimension_numbers<[1], [0], [0], [1], [0, 0, 1, 1], [], []>} : vector<128x256xbf16>, vector<256x256xbf16>, vector<128x256xf32> -> vector<128x256xf32>
    %23 = vector.broadcast %5 : vector<1x256xf32> to vector<128x256xf32>
    %24 = arith.addf %22, %23 : vector<128x256xf32>
    %c1_i32 = arith.constant 1 : i32
    %25 = arith.truncf %24 : vector<128x256xf32> to vector<128x256xbf16>
    %cst_17 = arith.constant dense<0.000000e+00> : vector<128x256xf32>
    %26 = tpu.matmul %25, %1, %cst_17 {dimension_numbers = #tpu.dot_dimension_numbers<[1], [0], [0], [1], [0, 0, 1, 1], [], []>} : vector<128x256xbf16>, vector<256x256xbf16>, vector<128x256xf32> -> vector<128x256xf32>
    %27 = vector.broadcast %4 : vector<1x256xf32> to vector<128x256xf32>
    %28 = arith.addf %26, %27 : vector<128x256xf32>
    %cst_18 = arith.constant 0.000000e+00 : f32
    %29 = vector.broadcast %cst_18 : f32 to vector<128x256xf32>
    %30 = arith.maximumf %28, %29 : vector<128x256xf32>
    %31 = arith.truncf %30 : vector<128x256xf32> to vector<128x256xbf16>
    %cst_19 = arith.constant dense<0.000000e+00> : vector<128x256xf32>
    %32 = tpu.matmul %31, %2, %cst_19 {dimension_numbers = #tpu.dot_dimension_numbers<[1], [0], [0], [1], [0, 0, 1, 1], [], []>} : vector<128x256xbf16>, vector<256x256xbf16>, vector<128x256xf32> -> vector<128x256xf32>
    %33 = vector.broadcast %5 : vector<1x256xf32> to vector<128x256xf32>
    %34 = arith.addf %32, %33 : vector<128x256xf32>
    %c2_i32 = arith.constant 2 : i32
    %35 = arith.truncf %34 : vector<128x256xf32> to vector<128x256xbf16>
    %cst_20 = arith.constant dense<0.000000e+00> : vector<128x256xf32>
    %36 = tpu.matmul %35, %1, %cst_20 {dimension_numbers = #tpu.dot_dimension_numbers<[1], [0], [0], [1], [0, 0, 1, 1], [], []>} : vector<128x256xbf16>, vector<256x256xbf16>, vector<128x256xf32> -> vector<128x256xf32>
    %37 = vector.broadcast %4 : vector<1x256xf32> to vector<128x256xf32>
    %38 = arith.addf %36, %37 : vector<128x256xf32>
    %cst_21 = arith.constant 0.000000e+00 : f32
    %39 = vector.broadcast %cst_21 : f32 to vector<128x256xf32>
    %40 = arith.maximumf %38, %39 : vector<128x256xf32>
    %41 = arith.truncf %40 : vector<128x256xf32> to vector<128x256xbf16>
    %cst_22 = arith.constant dense<0.000000e+00> : vector<128x256xf32>
    %42 = tpu.matmul %41, %2, %cst_22 {dimension_numbers = #tpu.dot_dimension_numbers<[1], [0], [0], [1], [0, 0, 1, 1], [], []>} : vector<128x256xbf16>, vector<256x256xbf16>, vector<128x256xf32> -> vector<128x256xf32>
    %43 = vector.broadcast %5 : vector<1x256xf32> to vector<128x256xf32>
    %44 = arith.addf %42, %43 : vector<128x256xf32>
    %c3_i32 = arith.constant 3 : i32
    %45 = arith.truncf %44 : vector<128x256xf32> to vector<128x256xbf16>
    %cst_23 = arith.constant dense<0.000000e+00> : vector<128x256xf32>
    %46 = tpu.matmul %45, %1, %cst_23 {dimension_numbers = #tpu.dot_dimension_numbers<[1], [0], [0], [1], [0, 0, 1, 1], [], []>} : vector<128x256xbf16>, vector<256x256xbf16>, vector<128x256xf32> -> vector<128x256xf32>
    %47 = vector.broadcast %4 : vector<1x256xf32> to vector<128x256xf32>
    %48 = arith.addf %46, %47 : vector<128x256xf32>
    %cst_24 = arith.constant 0.000000e+00 : f32
    %49 = vector.broadcast %cst_24 : f32 to vector<128x256xf32>
    %50 = arith.maximumf %48, %49 : vector<128x256xf32>
    %51 = arith.truncf %50 : vector<128x256xf32> to vector<128x256xbf16>
    %cst_25 = arith.constant dense<0.000000e+00> : vector<128x256xf32>
    %52 = tpu.matmul %51, %2, %cst_25 {dimension_numbers = #tpu.dot_dimension_numbers<[1], [0], [0], [1], [0, 0, 1, 1], [], []>} : vector<128x256xbf16>, vector<256x256xbf16>, vector<128x256xf32> -> vector<128x256xf32>
    %53 = vector.broadcast %5 : vector<1x256xf32> to vector<128x256xf32>
    %54 = arith.addf %52, %53 : vector<128x256xf32>
    %55 = arith.index_cast %7 : i32 to index
    %c0_26 = arith.constant 0 : index
    %56 = vector.load %arg8[%55, %c0_26] : memref<128x256xf32, #tpu.memory_space<vmem>>, vector<128x256xf32>
    tpu.vector_store %arg8[%55, %c0_26], %54 {strides = array<i32>} : memref<128x256xf32, #tpu.memory_space<vmem>>, vector<128x256xf32>,
    %c1_i32_27 = arith.constant 1 : i32
    return
  }
  func.func @transform_0(%arg0: i32) -> (i32, i32) {
    %c0_i32 = arith.constant 0 : i32
    %c0_i32_0 = arith.constant 0 : i32
    return %arg0, %c0_i32 : i32, i32
  }
  func.func @transform_1(%arg0: i32) -> (i32, i32) {
    %c0_i32 = arith.constant 0 : i32
    %c0_i32_0 = arith.constant 0 : i32
    %c0_i32_1 = arith.constant 0 : i32
    return %c0_i32, %c0_i32_0 : i32, i32
  }
  func.func @transform_2(%arg0: i32) -> (i32, i32) {
    %c0_i32 = arith.constant 0 : i32
    %c0_i32_0 = arith.constant 0 : i32
    %c0_i32_1 = arith.constant 0 : i32
    return %c0_i32, %c0_i32_0 : i32, i32
  }
  func.func @transform_3(%arg0: i32) -> (i32, i32) {
    %c0_i32 = arith.constant 0 : i32
    %c0_i32_0 = arith.constant 0 : i32
    %c0_i32_1 = arith.constant 0 : i32
    return %c0_i32, %c0_i32_0 : i32, i32
  }
  func.func @transform_4(%arg0: i32) -> (i32, i32) {
    %c0_i32 = arith.constant 0 : i32
    %c0_i32_0 = arith.constant 0 : i32
    %c0_i32_1 = arith.constant 0 : i32
    return %c0_i32, %c0_i32_0 : i32, i32
  }
  func.func @transform_5(%arg0: i32) -> (i32, i32) {
    %c0_i32 = arith.constant 0 : i32
    %c0_i32_0 = arith.constant 0 : i32
    %c0_i32_1 = arith.constant 0 : i32
    return %c0_i32, %c0_i32_0 : i32, i32
  }
  func.func @transform_6(%arg0: i32) -> (i32, i32) {
    %c0_i32 = arith.constant 0 : i32
    %c0_i32_0 = arith.constant 0 : i32
    %c0_i32_1 = arith.constant 0 : i32
    return %c0_i32, %c0_i32_0 : i32, i32
  }
  func.func @transform_7(%arg0: i32) -> (i32, i32) {
    %c0_i32 = arith.constant 0 : i32
    %c0_i32_0 = arith.constant 0 : i32
    return %arg0, %c0_i32 : i32, i32
  }
}

</mosaic_0001>

<bundles_post_ra>
// kernel: tpu_custom_call.1
= control target key start
LH: loop header
LB: loop body
LE: loop exit
PB: predicated region body
PF: predicated region fallthrough
CT: control target
= control target key end

     0   :  { %12 = vsyncpa [#allocation3], 0  ;;  %s3398_s0 = inlined_call_operand.hbm [shape: bf16[128,128], index: 0, kind: input, shape index: {}]   ;;  %s3399_s1 = inlined_call_operand.hbm [shape: bf16[128,256], index: 1, kind: input, shape index: {}]   ;;  %s3400_s2 = inlined_call_operand.vmem [shape: f32[1,256], index: 2, kind: input, shape index: {}]   ;;  %s3401_s3 = inlined_call_operand.hbm [shape: bf16[256,256], index: 3, kind: input, shape index: {}]   ;;  %s3402_s4 = inlined_call_operand.vmem [shape: f32[1,256], index: 4, kind: input, shape index: {}]   ;;  %s3403_s5 = inlined_call_operand.hbm [shape: bf16[256,256], index: 5, kind: input, shape index: {}]   ;;  %s3404_s6 = inlined_call_operand.vmem [shape: f32[1,256], index: 6, kind: input, shape index: {}]   ;;  %s3405_s7 = inlined_call_operand.hbm [shape: f32[128,256], index: 7, kind: output, shape index: {}]  }
   0x1   :  { %13 = vsyncpa [#allocation6], 0 }
   0x2   :  { %14 = vsyncpa [#allocation9], 0 }
   0x3   :  { %15 = vsyncpa [#allocation4], 0  ;;  %s2454_s24 = smov [#allocation5]  }
   0x4   :  { %s33_s25 = sshll.u32 %s2454_s24, 4  ;;  %s34_s25 = int_to_ptr.vmem [resolvable:$true] %s33_s25 }
   0x5   :  { %s2354_s26 = scalar_lea.vmem %s34_s25, 2048  ;;  %p2359_p1 = scmp.lt.s32.totalorder %s34_s25, %s34_s25 }
   0x6   :  { %p2355_p0 = scmp.ne.s32.totalorder %s34_s25, %s2354_s26  ;;  %p2360_p2 = scmp.lt.s32.totalorder %s2354_s26, %s2354_s26 }
   0x8   :  { %p2361_p3 = por %p2360_p2, %p2359_p1 }
   0xa   :  { %p2362_p4 = pnand %p2361_p3, %p2355_p0 }
   0xc   :  { %2365 = shalt.err (!%p2362_p4)
}
   0xd   :  { %s2455_s27 = smov 128   ;;  %s2456_s28 = smov 8  }
   0xe   :  { %39 = dma.hbm_to_vmem [thread:$0]  %s3399_s1, 2048, %s34_s25, [#allocation6], %s2455_s27, %s2455_s27, %s2456_s28  }
   0xf   :  { %s2457_s8 = smov [#allocation2]  }
  0x10   :  { %s21_s9 = sshll.u32 %s2457_s8, 4  ;;  %s22_s9 = int_to_ptr.vmem [resolvable:$true] %s21_s9 }
  0x11   :  { %s2374_s10 = scalar_lea.vmem %s22_s9, 1024  ;;  %p2379_p6 = scmp.lt.s32.totalorder %s22_s9, %s22_s9 }
  0x12   :  { %p2375_p5 = scmp.ne.s32.totalorder %s22_s9, %s2374_s10  ;;  %p2380_p7 = scmp.lt.s32.totalorder %s2374_s10, %s2374_s10 }
  0x14   :  { %p2381_p8 = por %p2380_p7, %p2379_p6 }
  0x16   :  { %p2382_p9 = pnand %p2381_p8, %p2375_p5 }
  0x18   :  { %2385 = shalt.err (!%p2382_p9)
}
  0x19   :  { %s2458_s11 = smov 64   ;;  %s2459_s12 = smov 4  }
  0x1a   :  { %27 = dma.hbm_to_vmem [thread:$0]  %s3398_s0, 1024, %s22_s9, [#allocation3], %s2458_s11, %s2458_s11, %s2459_s12  }
  0x1b   :  { %s2460_s15 = smov [#allocation7]   ;;  %s2461_s17 = smov [#allocation8]  }
  0x1c   :  { %s47_s16 = sshll.u32 %s2460_s15, 4  ;;  %s61_s1 = sshll.u32 %s2461_s17, 4  ;;  %s48_s16 = int_to_ptr.vmem [resolvable:$true] %s47_s16  ;;  %s62_s1 = int_to_ptr.vmem [resolvable:$true] %s61_s1 }
  0x1d   :  { %s2394_s18 = scalar_lea.vmem %s48_s16, 4096  ;;  %p2399_p11 = scmp.lt.s32.totalorder %s48_s16, %s48_s16 }
  0x1e   :  { %p2395_p10 = scmp.ne.s32.totalorder %s48_s16, %s2394_s18  ;;  %p2400_p12 = scmp.lt.s32.totalorder %s2394_s18, %s2394_s18 }
  0x20   :  { %p2401_p13 = por %p2400_p12, %p2399_p11 }
  0x22   :  { %p2402_p0 = pnand %p2401_p13, %p2395_p10 }
  0x24   :  { %2405 = shalt.err (!%p2402_p0)
}
  0x25   :  { %53 = dma.hbm_to_vmem [thread:$0]  %s3401_s3, 4096, %s48_s16, [#allocation6], %s2455_s27, %s2455_s27, %s2456_s28  }
  0x26   :  { %s2414_s0 = scalar_lea.vmem %s62_s1, 4096  ;;  %p2419_p2 = scmp.lt.s32.totalorder %s62_s1, %s62_s1 }
  0x27   :  { %p2415_p1 = scmp.ne.s32.totalorder %s62_s1, %s2414_s0  ;;  %p2420_p3 = scmp.lt.s32.totalorder %s2414_s0, %s2414_s0 }
  0x29   :  { %p2421_p4 = por %p2420_p3, %p2419_p2 }
  0x2b   :  { %p2422_p5 = pnand %p2421_p4, %p2415_p1 }
  0x2d   :  { %2425 = shalt.err (!%p2422_p5)
}
  0x2e   :  { %67 = dma.hbm_to_vmem [thread:$0]  %s3403_s5, 4096, %s62_s1, [#allocation9], %s2455_s27, %s2455_s27, %s2456_s28  }
  0x2f   :  { %2446 = dma.done.wait [#allocation3], 1024  }
  0x30   :  { %2447 = vsyncadd [#allocation3], 4294966272 }
  0x31   :  { %2448 = dma.done.wait [#allocation6], 6144  }
  0x32   :  { %2449 = vsyncadd [#allocation6], 4294961152 }
  0x33   :  { %2450 = dma.done.wait [#allocation9], 4096  }
  0x34   :  { %2451 = vsyncadd [#allocation9], 4294963200  ;;  %v2462_v0 = vmov 0   ;;  %v2154_v1 = vld [vmem:[#allocation5 + $0x74] ss:$8 sps:$4 sm:$0xff]   ;;  %v2178_v24 = vld [vmem:[#allocation2] sm:$0xff]  }
  0x35   :  { %353 = vmatprep.mubr.bf16.mxu0 %v2462_v0  ;;  %v2156_v2 = vld [vmem:[#allocation5 + $0x70] ss:$8 sps:$4 sm:$0xff]   ;;  %321 = vmatprep.subr.bf16.mxu0 %v2154_v1  ;;  %v2157_v3 = vld [vmem:[#allocation5 + $0x64] ss:$8 sps:$4 sm:$0xff]   ;;  %v2159_v4 = vld [vmem:[#allocation5 + $0x60] ss:$8 sps:$4 sm:$0xff]  }
  0x36   :  { %322 = vmatpush1.bf16.msra.mxu0 %v2156_v2  ;;  %v2160_v5 = vld [vmem:[#allocation5 + $0x54] ss:$8 sps:$4 sm:$0xff]   ;;  %v2162_v6 = vld [vmem:[#allocation5 + $0x50] ss:$8 sps:$4 sm:$0xff]   ;;  %v2163_v7 = vld [vmem:[#allocation5 + $0x44] ss:$8 sps:$4 sm:$0xff]  }
  0x37   :  { %323 = vmatprep.subr.bf16.mxu0 %v2157_v3  ;;  %v2165_v8 = vld [vmem:[#allocation5 + $0x40] ss:$8 sps:$4 sm:$0xff]   ;;  %v2166_v9 = vld [vmem:[#allocation5 + $0x34] ss:$8 sps:$4 sm:$0xff]   ;;  %v2168_v10 = vld [vmem:[#allocation5 + $0x30] ss:$8 sps:$4 sm:$0xff]  }
  0x38   :  { %v2169_v11 = vld [vmem:[#allocation5 + $0x24] ss:$8 sps:$4 sm:$0xff]   ;;  %v2171_v12 = vld [vmem:[#allocation5 + $0x20] ss:$8 sps:$4 sm:$0xff]   ;;  %v2172_v13 = vld [vmem:[#allocation5 + $0x14] ss:$8 sps:$4 sm:$0xff]  }
  0x39   :  { %v2528_v14 = vld [vmem:[#allocation7 + $0x74] ss:$8 sps:$4 sm:$0xff]   ;;  %v2530_v15 = vld [vmem:[#allocation7 + $0x70] ss:$8 sps:$4 sm:$0xff]   ;;  %v2532_v16 = vld [vmem:[#allocation7 + $0x64] ss:$8 sps:$4 sm:$0xff]  }
  0x3a   :  { %324 = vmatpush1.bf16.msra.mxu0 %v2159_v4  ;;  %653 = vmatprep.subr.bf16.mxu1 %v2528_v14  ;;  %v2536_v17 = vld [vmem:[#allocation7 + $0x60] ss:$8 sps:$4 sm:$0xff]   ;;  %v2174_v18 = vld [vmem:[#allocation5 + $0x10] ss:$8 sps:$4 sm:$0xff]   ;;  %v2539_v19 = vld [vmem:[#allocation7 + $0x54] ss:$8 sps:$4 sm:$0xff]  }
  0x3b   :  { %325 = vmatprep.subr.bf16.mxu0 %v2160_v5  ;;  %654 = vmatpush1.bf16.msra.mxu1 %v2530_v15  ;;  %v2175_v20 = vld [vmem:[#allocation5 + $0x4] ss:$8 sps:$4 sm:$0xff]   ;;  %v2542_v21 = vld [vmem:[#allocation7 + $0x50] ss:$8 sps:$4 sm:$0xff]   ;;  %v2177_v22 = vld [vmem:[#allocation5] ss:$8 sps:$4 sm:$0xff]  }
  0x3c   :  { %655 = vmatprep.subr.bf16.mxu1 %v2532_v16  ;;  %v2545_v23 = vld [vmem:[#allocation7 + $0x44] ss:$8 sps:$4 sm:$0xff]   ;;  %v2548_v25 = vld [vmem:[#allocation7 + $0x40] ss:$8 sps:$4 sm:$0xff]   ;;  %v2551_v26 = vld [vmem:[#allocation7 + $0x34] ss:$8 sps:$4 sm:$0xff]  }
  0x3d   :  { %v2554_v27 = vld [vmem:[#allocation7 + $0x30] ss:$8 sps:$4 sm:$0xff]   ;;  %v2558_v28 = vld [vmem:[#allocation7 + $0x24] ss:$8 sps:$4 sm:$0xff]   ;;  %v2560_v30 = vld [vmem:[#allocation7 + $0x20] ss:$8 sps:$4 sm:$0xff]  }
  0x3e   :  { %326 = vmatpush1.bf16.msra.mxu0 %v2162_v6  ;;  %v2179_v29 = vld [vmem:[#allocation2 + $0x8] sm:$0xff]   ;;  %v2562_v31 = vld [vmem:[#allocation7 + $0x14] ss:$8 sps:$4 sm:$0xff]   ;;  %v2566_v32 = vld [vmem:[#allocation7 + $0x10] ss:$8 sps:$4 sm:$0xff]  }
  0x3f   :  { %327 = vmatprep.subr.bf16.mxu0 %v2163_v7  ;;  %656 = vmatpush1.bf16.msra.mxu1 %v2536_v17  ;;  %v2568_v33 = vld [vmem:[#allocation7 + $0x4] ss:$8 sps:$4 sm:$0xff]   ;;  %v2180_v34 = vld [vmem:[#allocation2 + $0x10] sm:$0xff]   ;;  %v2573_v35 = vld [vmem:[#allocation7] ss:$8 sps:$4 sm:$0xff]  }
  0x40   :  { %657 = vmatprep.subr.bf16.mxu1 %v2539_v19  ;;  %v2575_v36 = vld [vmem:[#allocation7 + $0xf4] ss:$8 sps:$4 sm:$0xff]   ;;  %v2580_v37 = vld [vmem:[#allocation7 + $0xf0] ss:$8 sps:$4 sm:$0xff]   ;;  %v2584_v38 = vld [vmem:[#allocation7 + $0xe4] ss:$8 sps:$4 sm:$0xff]  }
  0x41   :  { %v2181_v39 = vld [vmem:[#allocation2 + $0x18] sm:$0xff]   ;;  %v2587_v40 = vld [vmem:[#allocation7 + $0xe0] ss:$8 sps:$4 sm:$0xff]   ;;  %v2597_v43 = vld [vmem:[#allocation7 + $0xc4] ss:$8 sps:$4 sm:$0xff]  }
  0x42   :  { %328 = vmatpush1.bf16.msra.mxu0 %v2165_v8  ;;  %v2590_v41 = vld [vmem:[#allocation7 + $0xd4] ss:$8 sps:$4 sm:$0xff]   ;;  %v2593_v42 = vld [vmem:[#allocation7 + $0xd0] ss:$8 sps:$4 sm:$0xff]   ;;  %v2182_v44 = vld [vmem:[#allocation2 + $0x20] sm:$0xff]  }
  0x43   :  { %329 = vmatprep.subr.bf16.mxu0 %v2166_v9  ;;  %658 = vmatpush1.bf16.msra.mxu1 %v2542_v21  ;;  %v2600_v45 = vld [vmem:[#allocation7 + $0xc0] ss:$8 sps:$4 sm:$0xff]   ;;  %v2603_v46 = vld [vmem:[#allocation7 + $0xb4] ss:$8 sps:$4 sm:$0xff]   ;;  %v2606_v47 = vld [vmem:[#allocation7 + $0xb0] ss:$8 sps:$4 sm:$0xff]  }
  0x44   :  { %659 = vmatprep.subr.bf16.mxu1 %v2545_v23  ;;  %v2183_v48 = vld [vmem:[#allocation2 + $0x28] sm:$0xff]   ;;  %v2184_v49 = vld [vmem:[#allocation2 + $0x30] sm:$0xff]   ;;  %v2185_v50 = vld [vmem:[#allocation2 + $0x38] sm:$0xff]  }
  0x45   :  { %v2613_v51 = vld [vmem:[#allocation7 + $0xa4] ss:$8 sps:$4 sm:$0xff]   ;;  %v2615_v52 = vld [vmem:[#allocation7 + $0xa0] ss:$8 sps:$4 sm:$0xff]   ;;  %v2619_v53 = vld [vmem:[#allocation7 + $0x94] ss:$8 sps:$4 sm:$0xff]  }
  0x46   :  { %330 = vmatpush1.bf16.msra.mxu0 %v2168_v10  ;;  %v2621_v54 = vld [vmem:[#allocation7 + $0x90] ss:$8 sps:$4 sm:$0xff]   ;;  %v2625_v55 = vld [vmem:[#allocation7 + $0x84] ss:$8 sps:$4 sm:$0xff]   ;;  %v2627_v56 = vld [vmem:[#allocation7 + $0x80] ss:$8 sps:$4 sm:$0xff]  }
  0x47   :  { %331 = vmatprep.subr.bf16.mxu0 %v2169_v11  ;;  %660 = vmatpush1.bf16.msra.mxu1 %v2548_v25  ;;  %v2632_v57 = vld [vmem:[#allocation8 + $0x74] ss:$8 sps:$4 sm:$0xff]   ;;  %v2634_v58 = vld [vmem:[#allocation8 + $0x70] ss:$8 sps:$4 sm:$0xff]   ;;  %v2636_v59 = vld [vmem:[#allocation8 + $0x64] ss:$8 sps:$4 sm:$0xff]  }
  0x48   :  { %661 = vmatprep.subr.bf16.mxu1 %v2551_v26  ;;  %v2640_v60 = vld [vmem:[#allocation8 + $0x60] ss:$8 sps:$4 sm:$0xff]   ;;  %v2643_v61 = vld [vmem:[#allocation8 + $0x54] ss:$8 sps:$4 sm:$0xff]   ;;  %v2646_v62 = vld [vmem:[#allocation8 + $0x50] ss:$8 sps:$4 sm:$0xff]  }
  0x49   :  { %v2649_v63 = vld [vmem:[#allocation8 + $0x44] ss:$8 sps:$4 sm:$0xff]   ;;  %v2655_v1 = vld [vmem:[#allocation8 + $0x34] ss:$8 sps:$4 sm:$0xff]   ;;  %v2658_v2 = vld [vmem:[#allocation8 + $0x30] ss:$8 sps:$4 sm:$0xff]  }
  0x4a   :  { %332 = vmatpush1.bf16.msra.mxu0 %v2171_v12  ;;  %v2661_v3 = vld [vmem:[#allocation8 + $0x24] ss:$8 sps:$4 sm:$0xff]   ;;  %v2664_v4 = vld [vmem:[#allocation8 + $0x20] ss:$8 sps:$4 sm:$0xff]   ;;  %v2667_v5 = vld [vmem:[#allocation8 + $0x14] ss:$8 sps:$4 sm:$0xff]  }
  0x4b   :  { %333 = vmatprep.subr.bf16.mxu0 %v2172_v13  ;;  %662 = vmatpush1.bf16.msra.mxu1 %v2554_v27  ;;  %3454 = vst [vmem:[#allocation15_spill] sm:$0xff] %v2661_v3  ;;  %3455 = vst [vmem:[#allocation16_spill] sm:$0xff] %v2664_v4  ;;  %v2670_v6 = vld [vmem:[#allocation8 + $0x10] ss:$8 sps:$4 sm:$0xff]   ;;  %v2673_v7 = vld [vmem:[#allocation8 + $0x4] ss:$8 sps:$4 sm:$0xff]  }
  0x4c   :  { %663 = vmatprep.subr.bf16.mxu1 %v2558_v28  ;;  %3456 = vst [vmem:[#allocation17_spill] sm:$0xff] %v2667_v5  ;;  %3457 = vst [vmem:[#allocation18_spill] sm:$0xff] %v2670_v6  ;;  %v2676_v8 = vld [vmem:[#allocation8] ss:$8 sps:$4 sm:$0xff]   ;;  %v2679_v9 = vld [vmem:[#allocation8 + $0xf4] ss:$8 sps:$4 sm:$0xff]  }
  0x4d   :  { %3458 = vst [vmem:[#allocation19_spill] sm:$0xff] %v2673_v7  ;;  %3459 = vst [vmem:[#allocation20_spill] sm:$0xff] %v2676_v8  ;;  %v2682_v10 = vld [vmem:[#allocation8 + $0xf0] ss:$8 sps:$4 sm:$0xff]   ;;  %v2685_v11 = vld [vmem:[#allocation8 + $0xe4] ss:$8 sps:$4 sm:$0xff]  }
  0x4e   :  { %334 = vmatpush1.bf16.msra.mxu0 %v2174_v18  ;;  %3460 = vst [vmem:[#allocation21_spill] sm:$0xff] %v2679_v9  ;;  %3461 = vst [vmem:[#allocation22_spill] sm:$0xff] %v2682_v10  ;;  %v2688_v12 = vld [vmem:[#allocation8 + $0xe0] ss:$8 sps:$4 sm:$0xff]   ;;  %v2691_v13 = vld [vmem:[#allocation8 + $0xd4] ss:$8 sps:$4 sm:$0xff]  }
  0x4f   :  { %335 = vmatprep.subr.bf16.mxu0 %v2175_v20  ;;  %664 = vmatpush1.bf16.msra.mxu1 %v2560_v30  ;;  %3462 = vst [vmem:[#allocation23_spill] sm:$0xff] %v2685_v11  ;;  %3463 = vst [vmem:[#allocation24_spill] sm:$0xff] %v2688_v12  ;;  %v2694_v18 = vld [vmem:[#allocation8 + $0xd0] ss:$8 sps:$4 sm:$0xff]   ;;  %v2697_v20 = vld [vmem:[#allocation8 + $0xc4] ss:$8 sps:$4 sm:$0xff]  }
  0x50   :  { %665 = vmatprep.subr.bf16.mxu1 %v2562_v31  ;;  %3464 = vst [vmem:[#allocation25_spill] sm:$0xff] %v2691_v13  ;;  %3465 = vst [vmem:[#allocation26_spill] sm:$0xff] %v2694_v18 }
  0x51   :  { %3466 = vst [vmem:[#allocation27_spill] sm:$0xff] %v2697_v20 }
  0x52   :  { %336 = vmatpush1.bf16.msra.mxu0 %v2177_v22  ;;  %v2700_v22 = vld [vmem:[#allocation8 + $0xc0] ss:$8 sps:$4 sm:$0xff]  }
  0x53   :  { %666 = vmatpush1.bf16.msra.mxu1 %v2566_v32  ;;  %985 = vmatprep.subr.bf16.mxu0 %v2632_v57  ;;  %3467 = vst [vmem:[#allocation28_spill] sm:$0xff] %v2700_v22 }
  0x54   :  { %667 = vmatprep.subr.bf16.mxu1 %v2568_v33 }
  0x55   :  { %354 = vmatmul.mubr.bf16.vlgmr.msra.gmra.mxu0 %v2178_v24  ;;  %v2703_v24 = vld [vmem:[#allocation8 + $0xb4] ss:$8 sps:$4 sm:$0xff]  }
  0x56   :  { %363 = vmatprep.mubr.bf16.mxu0 %v2462_v0  ;;  %986 = vmatpush1.bf16.msra.mxu0 %v2634_v58  ;;  %3468 = vst [vmem:[#allocation29_spill] sm:$0xff] %v2703_v24 }
  0x57   :  { %668 = vmatpush1.bf16.msra.mxu1 %v2573_v35  ;;  %987 = vmatprep.subr.bf16.mxu0 %v2636_v59 }
  0x58   :  { %669 = vmatprep.subr.bf16.mxu1 %v2575_v36 }
  0x5a   :  { %988 = vmatpush1.bf16.msra.mxu0 %v2640_v60 }
  0x5b   :  { %670 = vmatpush2.bf16.msra.mxu1 %v2580_v37  ;;  %989 = vmatprep.subr.bf16.mxu0 %v2643_v61 }
  0x5c   :  { %671 = vmatprep.subr.bf16.mxu1 %v2584_v38 }
  0x5d   :  { %364 = vmatmul.mubr.bf16.gmra.mxu0 %v2179_v29  ;;  %v2706_v29 = vld [vmem:[#allocation8 + $0xb0] ss:$8 sps:$4 sm:$0xff]  }
  0x5e   :  { %373 = vmatprep.mubr.bf16.mxu0 %v2462_v0  ;;  %990 = vmatpush1.bf16.msra.mxu0 %v2646_v62  ;;  %3469 = vst [vmem:[#allocation30_spill] sm:$0xff] %v2706_v29 }
  0x5f   :  { %672 = vmatpush2.bf16.msra.mxu1 %v2587_v40  ;;  %991 = vmatprep.subr.bf16.mxu0 %v2649_v63 }
  0x60   :  { %673 = vmatprep.subr.bf16.mxu1 %v2590_v41 }
  0x63   :  { %674 = vmatpush2.bf16.msra.mxu1 %v2593_v42 }
  0x64   :  { %675 = vmatprep.subr.bf16.mxu1 %v2597_v43 }
  0x65   :  { %374 = vmatmul.mubr.bf16.gmra.mxu0 %v2180_v34  ;;  %v183_v34 = vlaneseq }
  0x66   :  { %383 = vmatprep.mubr.bf16.mxu0 %v2462_v0 }
  0x67   :  { %676 = vmatpush2.bf16.msra.mxu1 %v2600_v45 }
  0x68   :  { %677 = vmatprep.subr.bf16.mxu1 %v2603_v46 }
  0x6b   :  { %678 = vmatpush2.bf16.msra.mxu1 %v2606_v47 }
  0x6c   :  { %679 = vmatprep.subr.bf16.mxu1 %v2613_v51 }
  0x6d   :  { %384 = vmatmul.mubr.bf16.gmra.mxu0 %v2181_v39  ;;  %v184_v39 = vshrl.u32 %v183_v34, 7 }
  0x6e   :  { %393 = vmatprep.mubr.bf16.mxu0 %v2462_v0 }
  0x6f   :  { %680 = vmatpush2.bf16.msra.mxu1 %v2615_v52 }
  0x70   :  { %681 = vmatprep.subr.bf16.mxu1 %v2619_v53 }
  0x73   :  { %682 = vmatpush2.bf16.msra.mxu1 %v2621_v54 }
  0x74   :  { %683 = vmatprep.subr.bf16.mxu1 %v2625_v55 }
  0x75   :  { %394 = vmatmul.mubr.bf16.gmra.mxu0 %v2182_v44  ;;  %v2710_v44 = vsub.s32 1, %v184_v39 }
  0x76   :  { %403 = vmatprep.mubr.bf16.mxu0 %v2462_v0 }
  0x77   :  { %684 = vmatpush2.bf16.msra.mxu1 %v2627_v56 }
  0x78   :  { %1114 = vmatprep.subr.bf16.mxu1 %v2528_v14 }
  0x7d   :  { %404 = vmatmul.mubr.bf16.gmra.mxu0 %v2183_v48  ;;  %v2712_v48 = vsub.s32 0, %v184_v39 }
  0x7e   :  { %413 = vmatprep.mubr.bf16.mxu0 %v2462_v0 }
  0x85   :  { %414 = vmatmul.mubr.bf16.gmra.mxu0 %v2184_v49  ;;  %v163_v49 = vld [vmem:[%s3400_s2] sm:$0x3] }
  0x86   :  { %423 = vmatprep.mubr.bf16.mxu0 %v2462_v0  ;;  %v2652_v0 = vld [vmem:[#allocation8 + $0x40] ss:$8 sps:$4 sm:$0xff]  }
  0x87   :  { %992 = vmatpush1.bf16.msra.mxu0 %v2652_v0 }
  0x88   :  { %993 = vmatprep.subr.bf16.mxu0 %v2655_v1 }
  0x8b   :  { %994 = vmatpush1.bf16.msra.mxu0 %v2658_v2 }
  0x8c   :  { %995 = vmatprep.subr.bf16.mxu0 %v2661_v3 }
  0x8d   :  { %424 = vmatmul.mubr.bf16.gmra.mxu0 %v2185_v50 }
  0x8f   :  { %996 = vmatpush1.bf16.msra.mxu0 %v2664_v4 }
  0x90   :  { %997 = vmatprep.subr.bf16.mxu0 %v2667_v5 }
  0x93   :  { %998 = vmatpush1.bf16.msra.mxu0 %v2670_v6 }
  0x94   :  { %999 = vmatprep.subr.bf16.mxu0 %v2673_v7 }
  0x97   :  { %1000 = vmatpush1.bf16.msra.mxu0 %v2676_v8 }
  0x98   :  { %1001 = vmatprep.subr.bf16.mxu0 %v2679_v9 }
  0x9b   :  { %1002 = vmatpush2.bf16.msra.mxu0 %v2682_v10 }
  0x9c   :  { %1003 = vmatprep.subr.bf16.mxu0 %v2685_v11 }
  0x9f   :  { %1004 = vmatpush2.bf16.msra.mxu0 %v2688_v12 }
  0xa0   :  { %1005 = vmatprep.subr.bf16.mxu0 %v2691_v13 }
  0xa3   :  { %1006 = vmatpush2.bf16.msra.mxu0 %v2694_v18 }
  0xa4   :  { %1007 = vmatprep.subr.bf16.mxu0 %v2697_v20  ;;  %v2718_v20 = vrot.slane %v163_v49, %v2710_v44 }
  0xa7   :  { %1008 = vmatpush2.bf16.msra.mxu0 %v2700_v22  ;;  %v2721_v22 = vrot.slane %v163_v49, %v2712_v48 }
  0xa8   :  { %1009 = vmatprep.subr.bf16.mxu0 %v2703_v24 }
  0xab   :  { %1010 = vmatpush2.bf16.msra.mxu0 %v2706_v29 }
 0x115   :  { %v355_v50 = vpop.f32.mrf.mxu0 }
 0x116   :  { %v356_v39 = vadd.f32 %v355_v50, %v2721_v22 }
 0x117   :  { %v357_v18 = vpop.f32.mrf.mxu0 }
 0x118   :  { %v358_v29 = vadd.f32 %v357_v18, %v2718_v20  ;;  %v434_v7 = vmax.f32 %v356_v39, 0.0 }
 0x119   :  { %v359_v24 = vpop.f32.mrf.mxu0 }
 0x11a   :  { %v360_v34 = vadd.f32 %v359_v24, %v2721_v22  ;;  %v435_v9 = vmax.f32 %v358_v29, 0.0 }
 0x11b   :  { %v361_v13 = vpop.f32.mrf.mxu0 }
 0x11c   :  { %v362_v12 = vadd.f32 %v361_v13, %v2718_v20  ;;  %v436_v11 = vmax.f32 %v360_v34, 0.0 }
 0x11d   :  { %v365_v10 = vpop.f32.mrf.mxu0 }
 0x11e   :  { %v437_v8 = vmax.f32 %v362_v12, 0.0  ;;  %v466_v49 = vpack.c.bf16 %v436_v11, %v434_v7  ;;  %v366_v24 = vadd.f32 %v365_v10, %v2721_v22 }
 0x11f   :  { %v367_v6 = vpop.f32.mrf.mxu0 }
 0x120   :  { %v467_v5 = vpack.c.bf16 %v437_v8, %v435_v9  ;;  %v368_v3 = vadd.f32 %v367_v6, %v2718_v20  ;;  %v438_v9 = vmax.f32 %v366_v24, 0.0 }
 0x121   :  { %v369_v4 = vpop.f32.mrf.mxu0 }
 0x122   :  { %v370_v18 = vadd.f32 %v369_v4, %v2721_v22  ;;  %685 = vmatprep.mubr.bf16.mxu1 %v467_v5  ;;  %v439_v8 = vmax.f32 %v368_v3, 0.0 }
 0x123   :  { %v371_v50 = vpop.f32.mrf.mxu0  ;;  %686 = vmatmul.mubr.bf16.vlgmr.msra.gmra.mxu1 %v466_v49 }
 0x124   :  { %v372_v13 = vadd.f32 %v371_v50, %v2718_v20  ;;  %1115 = vmatpush1.bf16.msra.mxu1 %v2530_v15  ;;  %v440_v29 = vmax.f32 %v370_v18, 0.0 }
 0x125   :  { %v375_v12 = vpop.f32.mrf.mxu0  ;;  %1116 = vmatprep.subr.bf16.mxu1 %v2532_v16 }
 0x126   :  { %v441_v7 = vmax.f32 %v372_v13, 0.0  ;;  %v468_v4 = vpack.c.bf16 %v440_v29, %v438_v9  ;;  %v376_v15 = vadd.f32 %v375_v12, %v2721_v22 }
 0x127   :  { %v377_v11 = vpop.f32.mrf.mxu0 }
 0x128   :  { %v469_v6 = vpack.c.bf16 %v441_v7, %v439_v8  ;;  %1117 = vmatpush1.bf16.msra.mxu1 %v2536_v17  ;;  %v378_v10 = vadd.f32 %v377_v11, %v2718_v20 }
 0x129   :  { %v379_v5 = vpop.f32.mrf.mxu0  ;;  %1118 = vmatprep.subr.bf16.mxu1 %v2539_v19  ;;  %v442_v19 = vmax.f32 %v376_v15, 0.0 }
 0x12a   :  { %v380_v34 = vadd.f32 %v379_v5, %v2721_v22  ;;  %695 = vmatprep.mubr.bf16.mxu1 %v469_v6  ;;  %v443_v17 = vmax.f32 %v378_v10, 0.0 }
 0x12b   :  { %v381_v39 = vpop.f32.mrf.mxu0  ;;  %696 = vmatmul.mubr.bf16.gmra.mxu1 %v468_v4 }
 0x12c   :  { %v382_v16 = vadd.f32 %v381_v39, %v2718_v20  ;;  %1119 = vmatpush1.bf16.msra.mxu1 %v2542_v21  ;;  %v444_v3 = vmax.f32 %v380_v34, 0.0 }
 0x12d   :  { %v385_v49 = vpop.f32.mrf.mxu0  ;;  %1120 = vmatprep.subr.bf16.mxu1 %v2545_v23 }
 0x12e   :  { %v445_v18 = vmax.f32 %v382_v16, 0.0  ;;  %v470_v13 = vpack.c.bf16 %v444_v3, %v442_v19  ;;  %v386_v21 = vadd.f32 %v385_v49, %v2721_v22 }
 0x12f   :  { %v387_v24 = vpop.f32.mrf.mxu0 }
 0x130   :  { %v471_v50 = vpack.c.bf16 %v445_v18, %v443_v17  ;;  %1121 = vmatpush1.bf16.msra.mxu1 %v2548_v25  ;;  %v388_v12 = vadd.f32 %v387_v24, %v2718_v20 }
 0x131   :  { %v389_v29 = vpop.f32.mrf.mxu0  ;;  %1122 = vmatprep.subr.bf16.mxu1 %v2551_v26  ;;  %v446_v26 = vmax.f32 %v386_v21, 0.0 }
 0x132   :  { %v390_v8 = vadd.f32 %v389_v29, %v2721_v22  ;;  %705 = vmatprep.mubr.bf16.mxu1 %v471_v50  ;;  %v447_v25 = vmax.f32 %v388_v12, 0.0 }
 0x133   :  { %v391_v7 = vpop.f32.mrf.mxu0  ;;  %706 = vmatmul.mubr.bf16.gmra.mxu1 %v470_v13 }
 0x134   :  { %v392_v23 = vadd.f32 %v391_v7, %v2718_v20  ;;  %1123 = vmatpush1.bf16.msra.mxu1 %v2554_v27  ;;  %v448_v9 = vmax.f32 %v390_v8, 0.0 }
 0x135   :  { %v395_v11 = vpop.f32.mrf.mxu0  ;;  %1124 = vmatprep.subr.bf16.mxu1 %v2558_v28 }
 0x136   :  { %v449_v6 = vmax.f32 %v392_v23, 0.0  ;;  %v472_v10 = vpack.c.bf16 %v448_v9, %v446_v26  ;;  %v396_v27 = vadd.f32 %v395_v11, %v2721_v22 }
 0x137   :  { %v397_v4 = vpop.f32.mrf.mxu0 }
 0x138   :  { %v473_v5 = vpack.c.bf16 %v449_v6, %v447_v25  ;;  %1125 = vmatpush1.bf16.msra.mxu1 %v2560_v30  ;;  %v398_v15 = vadd.f32 %v397_v4, %v2718_v20 }
 0x139   :  { %v399_v34 = vpop.f32.mrf.mxu0  ;;  %1126 = vmatprep.subr.bf16.mxu1 %v2562_v31  ;;  %v450_v31 = vmax.f32 %v396_v27, 0.0 }
 0x13a   :  { %v400_v39 = vadd.f32 %v399_v34, %v2721_v22  ;;  %715 = vmatprep.mubr.bf16.mxu1 %v473_v5  ;;  %v451_v30 = vmax.f32 %v398_v15, 0.0 }
 0x13b   :  { %v401_v16 = vpop.f32.mrf.mxu0  ;;  %716 = vmatmul.mubr.bf16.gmra.mxu1 %v472_v10 }
 0x13c   :  { %v402_v28 = vadd.f32 %v401_v16, %v2718_v20  ;;  %1127 = vmatpush1.bf16.msra.mxu1 %v2566_v32  ;;  %v452_v3 = vmax.f32 %v400_v39, 0.0 }
 0x13d   :  { %v405_v49 = vpop.f32.mrf.mxu0  ;;  %1128 = vmatprep.subr.bf16.mxu1 %v2568_v33 }
 0x13e   :  { %v453_v17 = vmax.f32 %v402_v28, 0.0  ;;  %v474_v24 = vpack.c.bf16 %v452_v3, %v450_v31  ;;  %v406_v32 = vadd.f32 %v405_v49, %v2721_v22 }
 0x13f   :  { %v407_v18 = vpop.f32.mrf.mxu0 }
 0x140   :  { %v475_v19 = vpack.c.bf16 %v453_v17, %v451_v30  ;;  %1129 = vmatpush1.bf16.msra.mxu1 %v2573_v35  ;;  %v408_v13 = vadd.f32 %v407_v18, %v2718_v20 }
 0x141   :  { %v409_v50 = vpop.f32.mrf.mxu0  ;;  %1130 = vmatprep.subr.bf16.mxu1 %v2575_v36  ;;  %v454_v36 = vmax.f32 %v406_v32, 0.0 }
 0x142   :  { %v410_v29 = vadd.f32 %v409_v50, %v2721_v22  ;;  %725 = vmatprep.mubr.bf16.mxu1 %v475_v19  ;;  %v455_v35 = vmax.f32 %v408_v13, 0.0 }
 0x143   :  { %v411_v12 = vpop.f32.mrf.mxu0  ;;  %726 = vmatmul.mubr.bf16.gmra.mxu1 %v474_v24 }
 0x144   :  { %v412_v33 = vadd.f32 %v411_v12, %v2718_v20  ;;  %1131 = vmatpush2.bf16.msra.mxu1 %v2580_v37  ;;  %v456_v8 = vmax.f32 %v410_v29, 0.0 }
 0x145   :  { %v415_v21 = vpop.f32.mrf.mxu0  ;;  %1132 = vmatprep.subr.bf16.mxu1 %v2584_v38 }
 0x146   :  { %v457_v7 = vmax.f32 %v412_v33, 0.0  ;;  %v476_v11 = vpack.c.bf16 %v456_v8, %v454_v36  ;;  %v416_v37 = vadd.f32 %v415_v21, %v2721_v22 }
 0x147   :  { %v417_v23 = vpop.f32.mrf.mxu0 }
 0x148   :  { %v477_v9 = vpack.c.bf16 %v457_v7, %v455_v35  ;;  %1133 = vmatpush2.bf16.msra.mxu1 %v2587_v40  ;;  %v418_v6 = vadd.f32 %v417_v23, %v2718_v20 }
 0x149   :  { %v419_v25 = vpop.f32.mrf.mxu0  ;;  %1134 = vmatprep.subr.bf16.mxu1 %v2590_v41  ;;  %v458_v41 = vmax.f32 %v416_v37, 0.0 }
 0x14a   :  { %v420_v26 = vadd.f32 %v419_v25, %v2721_v22  ;;  %735 = vmatprep.mubr.bf16.mxu1 %v477_v9  ;;  %v459_v40 = vmax.f32 %v418_v6, 0.0 }
 0x14b   :  { %v421_v4 = vpop.f32.mrf.mxu0  ;;  %736 = vmatmul.mubr.bf16.gmra.mxu1 %v476_v11 }
 0x14c   :  { %v422_v38 = vadd.f32 %v421_v4, %v2718_v20  ;;  %1135 = vmatpush2.bf16.msra.mxu1 %v2593_v42  ;;  %v460_v5 = vmax.f32 %v420_v26, 0.0 }
 0x14d   :  { %v425_v10 = vpop.f32.mrf.mxu0  ;;  %1136 = vmatprep.subr.bf16.mxu1 %v2597_v43 }
 0x14e   :  { %v461_v34 = vmax.f32 %v422_v38, 0.0  ;;  %v478_v27 = vpack.c.bf16 %v460_v5, %v458_v41  ;;  %v426_v42 = vadd.f32 %v425_v10, %v2721_v22 }
 0x14f   :  { %v427_v15 = vpop.f32.mrf.mxu0 }
 0x150   :  { %v479_v39 = vpack.c.bf16 %v461_v34, %v459_v40  ;;  %1137 = vmatpush2.bf16.msra.mxu1 %v2600_v45  ;;  %v428_v28 = vadd.f32 %v427_v15, %v2718_v20  ;;  %v462_v31 = vmax.f32 %v426_v42, 0.0 }
 0x151   :  { %v429_v16 = vpop.f32.mrf.mxu0  ;;  %1138 = vmatprep.subr.bf16.mxu1 %v2603_v46 }
 0x152   :  { %v430_v3 = vadd.f32 %v429_v16, %v2721_v22  ;;  %745 = vmatprep.mubr.bf16.mxu1 %v479_v39  ;;  %v463_v45 = vmax.f32 %v428_v28, 0.0 }
 0x153   :  { %v431_v49 = vpop.f32.mrf.mxu0  ;;  %746 = vmatmul.mubr.bf16.gmra.mxu1 %v478_v27 }
 0x154   :  { %v432_v43 = vadd.f32 %v431_v49, %v2718_v20  ;;  %1139 = vmatpush2.bf16.msra.mxu1 %v2606_v47  ;;  %v464_v30 = vmax.f32 %v430_v3, 0.0  ;;  %v2787_v47 = vld [vmem:[#allocation8 + $0xa4] ss:$8 sps:$4 sm:$0xff]  }
 0x155   :  { %1140 = vmatprep.subr.bf16.mxu1 %v2613_v51  ;;  %v2789_v51 = vld [vmem:[#allocation8 + $0xa0] ss:$8 sps:$4 sm:$0xff]   ;;  %1011 = vmatprep.subr.bf16.mxu0 %v2787_v47 }
 0x156   :  { %v465_v17 = vmax.f32 %v432_v43, 0.0  ;;  %v480_v18 = vpack.c.bf16 %v464_v30, %v462_v31  ;;  %1012 = vmatpush2.bf16.msra.mxu0 %v2789_v51 }
 0x158   :  { %v481_v46 = vpack.c.bf16 %v465_v17, %v463_v45  ;;  %1141 = vmatpush2.bf16.msra.mxu1 %v2615_v52  ;;  %v2793_v52 = vld [vmem:[#allocation8 + $0x94] ss:$8 sps:$4 sm:$0xff]  }
 0x159   :  { %1142 = vmatprep.subr.bf16.mxu1 %v2619_v53  ;;  %v2795_v53 = vld [vmem:[#allocation8 + $0x90] ss:$8 sps:$4 sm:$0xff]   ;;  %1013 = vmatprep.subr.bf16.mxu0 %v2793_v52 }
 0x15a   :  { %755 = vmatprep.mubr.bf16.mxu1 %v481_v46  ;;  %1014 = vmatpush2.bf16.msra.mxu0 %v2795_v53 }
 0x15b   :  { %756 = vmatmul.mubr.bf16.gmra.mxu1 %v480_v18 }
 0x15c   :  { %1143 = vmatpush2.bf16.msra.mxu1 %v2621_v54  ;;  %v2799_v54 = vld [vmem:[#allocation8 + $0x84] ss:$8 sps:$4 sm:$0xff]  }
 0x15d   :  { %1144 = vmatprep.subr.bf16.mxu1 %v2625_v55  ;;  %v2801_v55 = vld [vmem:[#allocation8 + $0x80] ss:$8 sps:$4 sm:$0xff]   ;;  %1015 = vmatprep.subr.bf16.mxu0 %v2799_v54 }
 0x15e   :  { %1016 = vmatpush2.bf16.msra.mxu0 %v2801_v55 }
 0x15f   :  { %1275 = vmatprep.subr.bf16.mxu0 %v2632_v57 }
 0x160   :  { %1145 = vmatpush2.bf16.msra.mxu1 %v2627_v56 }
 0x161   :  { %1404 = vmatprep.subr.bf16.mxu1 %v2528_v14  ;;  %v164_v14 = vld [vmem:[%s3402_s4] sm:$0x3] }
 0x162   :  { %v2810_v20 = vrot.slane %v164_v14, %v2710_v44  ;;  %v2813_v22 = vrot.slane %v164_v14, %v2712_v48 }
 0x1e3   :  { %v687_v56 = vpop.f32.mrf.mxu1 }
 0x1e4   :  { %v688_v29 = vadd.f32 %v687_v56, %v2813_v22 }
 0x1e5   :  { %v689_v19 = vpop.f32.mrf.mxu1 }
 0x1e6   :  { %v690_v50 = vadd.f32 %v689_v19, %v2810_v20  ;;  %v766_v7 = vmax.f32 %v688_v29, 0.0 }
 0x1e7   :  { %v691_v24 = vpop.f32.mrf.mxu1 }
 0x1e8   :  { %v692_v13 = vadd.f32 %v691_v24, %v2813_v22  ;;  %v767_v21 = vmax.f32 %v690_v50, 0.0 }
 0x1e9   :  { %v693_v32 = vpop.f32.mrf.mxu1 }
 0x1ea   :  { %v694_v12 = vadd.f32 %v693_v32, %v2810_v20  ;;  %v768_v33 = vmax.f32 %v692_v13, 0.0  ;;  %v3471_v32 = vld [vmem:[#allocation16_spill] sm:$0xff] }
 0x1eb   :  { %v697_v8 = vpop.f32.mrf.mxu1 }
 0x1ec   :  { %v769_v35 = vmax.f32 %v694_v12, 0.0  ;;  %v798_v9 = vpack.c.bf16 %v768_v33, %v766_v7  ;;  %v698_v26 = vadd.f32 %v697_v8, %v2813_v22  ;;  %v3472_v8 = vld [vmem:[#allocation17_spill] sm:$0xff] }
 0x1ed   :  { %v699_v36 = vpop.f32.mrf.mxu1 }
 0x1ee   :  { %v799_v23 = vpack.c.bf16 %v769_v35, %v767_v21  ;;  %v700_v25 = vadd.f32 %v699_v36, %v2810_v20  ;;  %v770_v34 = vmax.f32 %v698_v26, 0.0 }
 0x1ef   :  { %v701_v11 = vpop.f32.mrf.mxu1 }
 0x1f0   :  { %v702_v6 = vadd.f32 %v701_v11, %v2813_v22  ;;  %1017 = vmatprep.mubr.bf16.mxu0 %v799_v23  ;;  %v771_v10 = vmax.f32 %v700_v25, 0.0  ;;  %v3473_v23 = vld [vmem:[#allocation18_spill] sm:$0xff]  ;;  %v3474_v25 = vld [vmem:[#allocation19_spill] sm:$0xff] }
 0x1f1   :  { %v703_v37 = vpop.f32.mrf.mxu1  ;;  %1018 = vmatmul.mubr.bf16.vlgmr.msra.gmra.mxu0 %v798_v9 }
 0x1f2   :  { %v704_v4 = vadd.f32 %v703_v37, %v2810_v20  ;;  %1276 = vmatpush1.bf16.msra.mxu0 %v2634_v58  ;;  %v772_v38 = vmax.f32 %v702_v6, 0.0 }
 0x1f3   :  { %v707_v5 = vpop.f32.mrf.mxu1  ;;  %1277 = vmatprep.subr.bf16.mxu0 %v2636_v59 }
 0x1f4   :  { %v773_v40 = vmax.f32 %v704_v4, 0.0  ;;  %v800_v39 = vpack.c.bf16 %v772_v38, %v770_v34  ;;  %v708_v58 = vadd.f32 %v707_v5, %v2813_v22  ;;  %v3475_v5 = vld [vmem:[#allocation20_spill] sm:$0xff]  ;;  %v3476_v34 = vld [vmem:[#allocation21_spill] sm:$0xff] }
 0x1f5   :  { %v709_v41 = vpop.f32.mrf.mxu1 }
 0x1f6   :  { %v801_v15 = vpack.c.bf16 %v773_v40, %v771_v10  ;;  %1278 = vmatpush1.bf16.msra.mxu0 %v2640_v60  ;;  %v710_v16 = vadd.f32 %v709_v41, %v2810_v20 }
 0x1f7   :  { %v711_v27 = vpop.f32.mrf.mxu1  ;;  %1279 = vmatprep.subr.bf16.mxu0 %v2643_v61  ;;  %v774_v61 = vmax.f32 %v708_v58, 0.0 }
 0x1f8   :  { %v712_v28 = vadd.f32 %v711_v27, %v2813_v22  ;;  %1027 = vmatprep.mubr.bf16.mxu0 %v801_v15  ;;  %v775_v60 = vmax.f32 %v710_v16, 0.0 }
 0x1f9   :  { %v713_v3 = vpop.f32.mrf.mxu1  ;;  %1028 = vmatmul.mubr.bf16.gmra.mxu0 %v800_v39 }
 0x1fa   :  { %v714_v59 = vadd.f32 %v713_v3, %v2810_v20  ;;  %1280 = vmatpush1.bf16.msra.mxu0 %v2646_v62  ;;  %v776_v42 = vmax.f32 %v712_v28, 0.0  ;;  %v3477_v28 = vld [vmem:[#allocation22_spill] sm:$0xff] }
 0x1fb   :  { %v717_v49 = vpop.f32.mrf.mxu1  ;;  %1281 = vmatprep.subr.bf16.mxu0 %v2649_v63 }
 0x1fc   :  { %v777_v43 = vmax.f32 %v714_v59, 0.0  ;;  %v802_v17 = vpack.c.bf16 %v776_v42, %v774_v61  ;;  %v718_v62 = vadd.f32 %v717_v49, %v2813_v22  ;;  %v3478_v59 = vld [vmem:[#allocation23_spill] sm:$0xff] }
 0x1fd   :  { %v719_v30 = vpop.f32.mrf.mxu1 }
 0x1fe   :  { %v803_v45 = vpack.c.bf16 %v777_v43, %v775_v60  ;;  %1282 = vmatpush1.bf16.msra.mxu0 %v2652_v0  ;;  %v720_v46 = vadd.f32 %v719_v30, %v2810_v20  ;;  %v3470_v0 = vld [vmem:[#allocation15_spill] sm:$0xff]  ;;  %v3479_v30 = vld [vmem:[#allocation24_spill] sm:$0xff] }
 0x1ff   :  { %v721_v31 = vpop.f32.mrf.mxu1  ;;  %1283 = vmatprep.subr.bf16.mxu0 %v2655_v1  ;;  %v778_v1 = vmax.f32 %v718_v62, 0.0 }
 0x200   :  { %v722_v18 = vadd.f32 %v721_v31, %v2813_v22  ;;  %1037 = vmatprep.mubr.bf16.mxu0 %v803_v45  ;;  %v779_v24 = vmax.f32 %v720_v46, 0.0  ;;  %v3480_v31 = vld [vmem:[#allocation25_spill] sm:$0xff] }
 0x201   :  { %v723_v14 = vpop.f32.mrf.mxu1  ;;  %1038 = vmatmul.mubr.bf16.gmra.mxu0 %v802_v17 }
 0x202   :  { %v724_v63 = vadd.f32 %v723_v14, %v2810_v20  ;;  %1284 = vmatpush1.bf16.msra.mxu0 %v2658_v2  ;;  %v780_v56 = vmax.f32 %v722_v18, 0.0 }
 0x203   :  { %v727_v19 = vpop.f32.mrf.mxu1  ;;  %1285 = vmatprep.subr.bf16.mxu0 %v3470_v0 }
 0x204   :  { %v781_v50 = vmax.f32 %v724_v63, 0.0  ;;  %v804_v12 = vpack.c.bf16 %v780_v56, %v778_v1  ;;  %v728_v2 = vadd.f32 %v727_v19, %v2813_v22  ;;  %v3481_v56 = vld [vmem:[#allocation26_spill] sm:$0xff] }
 0x205   :  { %v729_v13 = vpop.f32.mrf.mxu1 }
 0x206   :  { %v805_v29 = vpack.c.bf16 %v781_v50, %v779_v24  ;;  %1286 = vmatpush1.bf16.msra.mxu0 %v3471_v32  ;;  %v730_v21 = vadd.f32 %v729_v13, %v2810_v20  ;;  %v782_v37 = vmax.f32 %v728_v2, 0.0  ;;  %v3482_v24 = vld [vmem:[#allocation27_spill] sm:$0xff] }
 0x207   :  { %v731_v33 = vpop.f32.mrf.mxu1  ;;  %1287 = vmatprep.subr.bf16.mxu0 %v3472_v8 }
 0x208   :  { %v732_v35 = vadd.f32 %v731_v33, %v2813_v22  ;;  %1047 = vmatprep.mubr.bf16.mxu0 %v805_v29  ;;  %v783_v6 = vmax.f32 %v730_v21, 0.0  ;;  %v3484_v21 = vld [vmem:[#allocation29_spill] sm:$0xff] }
 0x209   :  { %v733_v7 = vpop.f32.mrf.mxu1  ;;  %1048 = vmatmul.mubr.bf16.gmra.mxu0 %v804_v12  ;;  %v3483_v12 = vld [vmem:[#allocation28_spill] sm:$0xff] }
 0x20a   :  { %v734_v36 = vadd.f32 %v733_v7, %v2810_v20  ;;  %1288 = vmatpush1.bf16.msra.mxu0 %v3473_v23  ;;  %v784_v9 = vmax.f32 %v732_v35, 0.0 }
 0x20b   :  { %v737_v11 = vpop.f32.mrf.mxu1  ;;  %1289 = vmatprep.subr.bf16.mxu0 %v3474_v25 }
 0x20c   :  { %v785_v26 = vmax.f32 %v734_v36, 0.0  ;;  %v806_v10 = vpack.c.bf16 %v784_v9, %v782_v37  ;;  %v738_v39 = vadd.f32 %v737_v11, %v2813_v22  ;;  %v3485_v9 = vld [vmem:[#allocation30_spill] sm:$0xff] }
 0x20d   :  { %v739_v4 = vpop.f32.mrf.mxu1 }
 0x20e   :  { %v807_v38 = vpack.c.bf16 %v785_v26, %v783_v6  ;;  %1290 = vmatpush1.bf16.msra.mxu0 %v3475_v5  ;;  %v740_v41 = vadd.f32 %v739_v4, %v2810_v20  ;;  %v786_v60 = vmax.f32 %v738_v39, 0.0  ;;  %v165_v5 = vld [vmem:[%s3404_s6] sm:$0x3]  ;;  %s2463_s6 = smov [#allocation10]  }
 0x20f   :  { %v741_v40 = vpop.f32.mrf.mxu1  ;;  %1291 = vmatprep.subr.bf16.mxu0 %v3476_v34  ;;  %v2886_v34 = vrot.slane %v165_v5, %v2712_v48  ;;  %s2008_s25 = sshll.u32 %s2463_s6, 4  ;;  %s2009_s25 = int_to_ptr.vmem [resolvable:$true] %s2008_s25 }
 0x210   :  { %v742_v15 = vadd.f32 %v741_v40, %v2813_v22  ;;  %1057 = vmatprep.mubr.bf16.mxu0 %v807_v38  ;;  %v787_v42 = vmax.f32 %v740_v41, 0.0  ;;  %v2883_v40 = vrot.slane %v165_v5, %v2710_v44  ;;  %s2426_s26 = scalar_lea.vmem %s2009_s25, 4096  ;;  %p2431_p7 = scmp.lt.s32.totalorder %s2009_s25, %s2009_s25 }
 0x211   :  { %v743_v27 = vpop.f32.mrf.mxu1  ;;  %1058 = vmatmul.mubr.bf16.gmra.mxu0 %v806_v10  ;;  %p2427_p6 = scmp.ne.s32.totalorder %s2009_s25, %s2426_s26  ;;  %p2432_p8 = scmp.lt.s32.totalorder %s2426_s26, %s2426_s26 }
 0x212   :  { %v744_v16 = vadd.f32 %v743_v27, %v2810_v20  ;;  %1292 = vmatpush2.bf16.msra.mxu0 %v3477_v28  ;;  %v788_v58 = vmax.f32 %v742_v15, 0.0 }
 0x213   :  { %v747_v3 = vpop.f32.mrf.mxu1  ;;  %1293 = vmatprep.subr.bf16.mxu0 %v3478_v59  ;;  %p2433_p9 = por %p2432_p8, %p2431_p7 }
 0x214   :  { %v789_v49 = vmax.f32 %v744_v16, 0.0  ;;  %v808_v45 = vpack.c.bf16 %v788_v58, %v786_v60  ;;  %v748_v62 = vadd.f32 %v747_v3, %v2813_v22  ;;  %v2896_v60 = vld [vmem:[#allocation7 + $0x64] ss:$8 sps:$4 sm:$0xff]  }
 0x215   :  { %v749_v43 = vpop.f32.mrf.mxu1  ;;  %p2434_p10 = pnand %p2433_p9, %p2427_p6 }
 0x216   :  { %v809_v61 = vpack.c.bf16 %v789_v49, %v787_v42  ;;  %1294 = vmatpush2.bf16.msra.mxu0 %v3479_v30  ;;  %v750_v46 = vadd.f32 %v749_v43, %v2810_v20  ;;  %v790_v13 = vmax.f32 %v748_v62, 0.0  ;;  %v2892_v42 = vld [vmem:[#allocation7 + $0x70] ss:$8 sps:$4 sm:$0xff]   ;;  %v2905_v62 = vld [vmem:[#allocation7 + $0x54] ss:$8 sps:$4 sm:$0xff]  }
 0x217   :  { %v751_v17 = vpop.f32.mrf.mxu1  ;;  %1295 = vmatprep.subr.bf16.mxu0 %v3480_v31  ;;  %v2902_v31 = vld [vmem:[#allocation7 + $0x60] ss:$8 sps:$4 sm:$0xff]  }
 0x218   :  { %v752_v18 = vadd.f32 %v751_v17, %v2813_v22  ;;  %1067 = vmatprep.mubr.bf16.mxu0 %v809_v61  ;;  %v791_v50 = vmax.f32 %v750_v46, 0.0 }
 0x219   :  { %v753_v14 = vpop.f32.mrf.mxu1  ;;  %1068 = vmatmul.mubr.bf16.gmra.mxu0 %v808_v45 }
 0x21a   :  { %v754_v63 = vadd.f32 %v753_v14, %v2810_v20  ;;  %1296 = vmatpush2.bf16.msra.mxu0 %v3481_v56  ;;  %v792_v19 = vmax.f32 %v752_v18, 0.0 }
 0x21b   :  { %v757_v0 = vpop.f32.mrf.mxu1  ;;  %1297 = vmatprep.subr.bf16.mxu0 %v3482_v24 }
 0x21c   :  { %v793_v1 = vmax.f32 %v754_v63, 0.0  ;;  %v810_v33 = vpack.c.bf16 %v792_v19, %v790_v13  ;;  %v758_v7 = vadd.f32 %v757_v0, %v2813_v22  ;;  %v2908_v63 = vld [vmem:[#allocation7 + $0x50] ss:$8 sps:$4 sm:$0xff]   ;;  %v2912_v0 = vld [vmem:[#allocation7 + $0x44] ss:$8 sps:$4 sm:$0xff]  }
 0x21d   :  { %v759_v29 = vpop.f32.mrf.mxu1 }
 0x21e   :  { %v811_v32 = vpack.c.bf16 %v793_v1, %v791_v50  ;;  %1298 = vmatpush2.bf16.msra.mxu0 %v3483_v12  ;;  %v760_v35 = vadd.f32 %v759_v29, %v2810_v20  ;;  %v794_v26 = vmax.f32 %v758_v7, 0.0 }
 0x21f   :  { %v761_v8 = vpop.f32.mrf.mxu1  ;;  %1299 = vmatprep.subr.bf16.mxu0 %v3484_v21 }
 0x220   :  { %v762_v2 = vadd.f32 %v761_v8, %v2813_v22  ;;  %1077 = vmatprep.mubr.bf16.mxu0 %v811_v32  ;;  %v795_v25 = vmax.f32 %v760_v35, 0.0  ;;  %v2918_v32 = vld [vmem:[#allocation7 + $0x40] ss:$8 sps:$4 sm:$0xff]   ;;  %v2921_v8 = vld [vmem:[#allocation7 + $0x34] ss:$8 sps:$4 sm:$0xff]  }
 0x221   :  { %v763_v36 = vpop.f32.mrf.mxu1  ;;  %1078 = vmatmul.mubr.bf16.gmra.mxu0 %v810_v33  ;;  %v2924_v35 = vld [vmem:[#allocation7 + $0x30] ss:$8 sps:$4 sm:$0xff]  }
 0x222   :  { %v764_v23 = vadd.f32 %v763_v36, %v2810_v20  ;;  %1300 = vmatpush2.bf16.msra.mxu0 %v3485_v9  ;;  %v796_v11 = vmax.f32 %v762_v2, 0.0  ;;  %v2928_v36 = vld [vmem:[#allocation7 + $0x24] ss:$8 sps:$4 sm:$0xff]  }
 0x223   :  { %1301 = vmatprep.subr.bf16.mxu0 %v2787_v47 }
 0x224   :  { %v797_v6 = vmax.f32 %v764_v23, 0.0  ;;  %v812_v4 = vpack.c.bf16 %v796_v11, %v794_v26  ;;  %v2934_v26 = vld [vmem:[#allocation7 + $0x20] ss:$8 sps:$4 sm:$0xff]  }
 0x226   :  { %v813_v37 = vpack.c.bf16 %v797_v6, %v795_v25  ;;  %1302 = vmatpush2.bf16.msra.mxu0 %v2789_v51 }
 0x227   :  { %1303 = vmatprep.subr.bf16.mxu0 %v2793_v52 }
 0x228   :  { %1087 = vmatprep.mubr.bf16.mxu0 %v813_v37 }
 0x229   :  { %1088 = vmatmul.mubr.bf16.gmra.mxu0 %v812_v4 }
 0x22a   :  { %1304 = vmatpush2.bf16.msra.mxu0 %v2795_v53 }
 0x22b   :  { %1305 = vmatprep.subr.bf16.mxu0 %v2799_v54 }
 0x22e   :  { %1306 = vmatpush2.bf16.msra.mxu0 %v2801_v55 }
 0x22f   :  { %1565 = vmatprep.subr.bf16.mxu0 %v2632_v57 }
 0x2b1   :  { %v1019_v38 = vpop.f32.mrf.mxu0 }
 0x2b2   :  { %v1020_v16 = vadd.f32 %v1019_v38, %v2886_v34  ;;  %v2937_v38 = vld [vmem:[#allocation7 + $0x14] ss:$8 sps:$4 sm:$0xff]  }
 0x2b3   :  { %v1021_v10 = vpop.f32.mrf.mxu0 }
 0x2b4   :  { %v1022_v27 = vadd.f32 %v1021_v10, %v2883_v40  ;;  %v2940_v10 = vld [vmem:[#allocation7 + $0x10] ss:$8 sps:$4 sm:$0xff]  }
 0x2b5   :  { %v1023_v41 = vpop.f32.mrf.mxu0 }
 0x2b6   :  { %v1024_v15 = vadd.f32 %v1023_v41, %v2886_v34 }
 0x2b7   :  { %v1025_v39 = vpop.f32.mrf.mxu0 }
 0x2b8   :  { %v1026_v57 = vadd.f32 %v1025_v39, %v2883_v40  ;;  %v1098_v3 = vpack.c.bf16 %v1024_v15, %v1020_v16  ;;  %v2944_v39 = vld [vmem:[#allocation7 + $0x4] ss:$8 sps:$4 sm:$0xff]  }
 0x2b9   :  { %v1029_v28 = vpop.f32.mrf.mxu0 }
 0x2ba   :  { %v1099_v58 = vpack.c.bf16 %v1026_v57, %v1022_v27  ;;  %v1030_v30 = vadd.f32 %v1029_v28, %v2886_v34 }
 0x2bb   :  { %v1031_v59 = vpop.f32.mrf.mxu0 }
 0x2bc   :  { %1146 = vmatprep.mubr.bf16.mxu1 %v1099_v58  ;;  %v1032_v43 = vadd.f32 %v1031_v59, %v2883_v40 }
 0x2bd   :  { %v1033_v44 = vpop.f32.mrf.mxu0  ;;  %1147 = vmatmul.mubr.bf16.vlgmr.msra.gmra.mxu1 %v1098_v3  ;;  %v2950_v3 = vld [vmem:[#allocation7] ss:$8 sps:$4 sm:$0xff]  }
 0x2be   :  { %1405 = vmatpush1.bf16.msra.mxu1 %v2892_v42  ;;  %v1034_v48 = vadd.f32 %v1033_v44, %v2886_v34 }
 0x2bf   :  { %v1035_v49 = vpop.f32.mrf.mxu0  ;;  %1406 = vmatprep.subr.bf16.mxu1 %v2896_v60 }
 0x2c0   :  { %v1036_v61 = vadd.f32 %v1035_v49, %v2883_v40  ;;  %v1100_v46 = vpack.c.bf16 %v1034_v48, %v1030_v30  ;;  %v2953_v48 = vld [vmem:[#allocation7 + $0xf4] ss:$8 sps:$4 sm:$0xff]  }
 0x2c1   :  { %v1039_v45 = vpop.f32.mrf.mxu0 }
 0x2c2   :  { %v1101_v17 = vpack.c.bf16 %v1036_v61, %v1032_v43  ;;  %1407 = vmatpush1.bf16.msra.mxu1 %v2902_v31  ;;  %v1040_v1 = vadd.f32 %v1039_v45, %v2886_v34  ;;  %v2956_v43 = vld [vmem:[#allocation7 + $0xf0] ss:$8 sps:$4 sm:$0xff]   ;;  %v2960_v45 = vld [vmem:[#allocation7 + $0xe4] ss:$8 sps:$4 sm:$0xff]  }
 0x2c3   :  { %v1041_v18 = vpop.f32.mrf.mxu0  ;;  %1408 = vmatprep.subr.bf16.mxu1 %v2905_v62 }
 0x2c4   :  { %1156 = vmatprep.mubr.bf16.mxu1 %v1101_v17  ;;  %v1042_v24 = vadd.f32 %v1041_v18, %v2883_v40 }
 0x2c5   :  { %v1043_v14 = vpop.f32.mrf.mxu0  ;;  %1157 = vmatmul.mubr.bf16.gmra.mxu1 %v1100_v46 }
 0x2c6   :  { %1409 = vmatpush1.bf16.msra.mxu1 %v2908_v63  ;;  %v1044_v56 = vadd.f32 %v1043_v14, %v2886_v34 }
 0x2c7   :  { %v1045_v19 = vpop.f32.mrf.mxu0  ;;  %1410 = vmatprep.subr.bf16.mxu1 %v2912_v0 }
 0x2c8   :  { %v1046_v50 = vadd.f32 %v1045_v19, %v2883_v40  ;;  %v1102_v12 = vpack.c.bf16 %v1044_v56, %v1040_v1  ;;  %v2966_v19 = vld [vmem:[#allocation7 + $0xe0] ss:$8 sps:$4 sm:$0xff]   ;;  %v2969_v1 = vld [vmem:[#allocation7 + $0xd4] ss:$8 sps:$4 sm:$0xff]  }
 0x2c9   :  { %v1049_v13 = vpop.f32.mrf.mxu0 }
 0x2ca   :  { %v1103_v29 = vpack.c.bf16 %v1046_v50, %v1042_v24  ;;  %1411 = vmatpush1.bf16.msra.mxu1 %v2918_v32  ;;  %v1050_v11 = vadd.f32 %v1049_v13, %v2886_v34 }
 0x2cb   :  { %v1051_v33 = vpop.f32.mrf.mxu0  ;;  %1412 = vmatprep.subr.bf16.mxu1 %v2921_v8 }
 0x2cc   :  { %1166 = vmatprep.mubr.bf16.mxu1 %v1103_v29  ;;  %v1052_v23 = vadd.f32 %v1051_v33, %v2883_v40  ;;  %v2972_v29 = vld [vmem:[#allocation7 + $0xd0] ss:$8 sps:$4 sm:$0xff]  }
 0x2cd   :  { %v1053_v21 = vpop.f32.mrf.mxu0  ;;  %1167 = vmatmul.mubr.bf16.gmra.mxu1 %v1102_v12 }
 0x2ce   :  { %1413 = vmatpush1.bf16.msra.mxu1 %v2924_v35  ;;  %v1054_v2 = vadd.f32 %v1053_v21, %v2886_v34  ;;  %v2976_v21 = vld [vmem:[#allocation7 + $0xc4] ss:$8 sps:$4 sm:$0xff]  }
 0x2cf   :  { %v1055_v7 = vpop.f32.mrf.mxu0  ;;  %1414 = vmatprep.subr.bf16.mxu1 %v2928_v36 }
 0x2d0   :  { %v1056_v9 = vadd.f32 %v1055_v7, %v2883_v40  ;;  %v1104_v37 = vpack.c.bf16 %v1054_v2, %v1050_v11 }
 0x2d1   :  { %v1059_v25 = vpop.f32.mrf.mxu0 }
 0x2d2   :  { %v1105_v6 = vpack.c.bf16 %v1056_v9, %v1052_v23  ;;  %1415 = vmatpush1.bf16.msra.mxu1 %v2934_v26  ;;  %v1060_v16 = vadd.f32 %v1059_v25, %v2886_v34  ;;  %v2982_v25 = vld [vmem:[#allocation7 + $0xc0] ss:$8 sps:$4 sm:$0xff]  }
 0x2d3   :  { %v1061_v4 = vpop.f32.mrf.mxu0  ;;  %1416 = vmatprep.subr.bf16.mxu1 %v2937_v38 }
 0x2d4   :  { %1176 = vmatprep.mubr.bf16.mxu1 %v1105_v6  ;;  %v1062_v27 = vadd.f32 %v1061_v4, %v2883_v40  ;;  %v2985_v4 = vld [vmem:[#allocation7 + $0xb4] ss:$8 sps:$4 sm:$0xff]  }
 0x2d5   :  { %v1063_v5 = vpop.f32.mrf.mxu0  ;;  %1177 = vmatmul.mubr.bf16.gmra.mxu1 %v1104_v37 }
 0x2d6   :  { %1417 = vmatpush1.bf16.msra.mxu1 %v2940_v10  ;;  %v1064_v41 = vadd.f32 %v1063_v5, %v2886_v34 }
 0x2d7   :  { %v1065_v15 = vpop.f32.mrf.mxu0  ;;  %1418 = vmatprep.subr.bf16.mxu1 %v2944_v39 }
 0x2d8   :  { %v1066_v57 = vadd.f32 %v1065_v15, %v2883_v40  ;;  %v1106_v59 = vpack.c.bf16 %v1064_v41, %v1060_v16  ;;  %v2988_v41 = vld [vmem:[#allocation7 + $0xb0] ss:$8 sps:$4 sm:$0xff]  }
 0x2d9   :  { %v1069_v28 = vpop.f32.mrf.mxu0 }
 0x2da   :  { %v1107_v58 = vpack.c.bf16 %v1066_v57, %v1062_v27  ;;  %1419 = vmatpush1.bf16.msra.mxu1 %v2950_v3  ;;  %v1070_v18 = vadd.f32 %v1069_v28, %v2886_v34  ;;  %v2992_v57 = vld [vmem:[#allocation7 + $0xa4] ss:$8 sps:$4 sm:$0xff]  }
 0x2db   :  { %v1071_v44 = vpop.f32.mrf.mxu0  ;;  %1420 = vmatprep.subr.bf16.mxu1 %v2953_v48 }
 0x2dc   :  { %1186 = vmatprep.mubr.bf16.mxu1 %v1107_v58  ;;  %v1072_v17 = vadd.f32 %v1071_v44, %v2883_v40  ;;  %v2998_v44 = vld [vmem:[#allocation7 + $0xa0] ss:$8 sps:$4 sm:$0xff]  }
 0x2dd   :  { %v1073_v49 = vpop.f32.mrf.mxu0  ;;  %1187 = vmatmul.mubr.bf16.gmra.mxu1 %v1106_v59 }
 0x2de   :  { %1421 = vmatpush2.bf16.msra.mxu1 %v2956_v43  ;;  %v1074_v61 = vadd.f32 %v1073_v49, %v2886_v34 }
 0x2df   :  { %v1075_v30 = vpop.f32.mrf.mxu0  ;;  %1422 = vmatprep.subr.bf16.mxu1 %v2960_v45 }
 0x2e0   :  { %v1076_v46 = vadd.f32 %v1075_v30, %v2883_v40  ;;  %v1108_v24 = vpack.c.bf16 %v1074_v61, %v1070_v18  ;;  %v3001_v61 = vld [vmem:[#allocation7 + $0x94] ss:$8 sps:$4 sm:$0xff]   ;;  %v3004_v30 = vld [vmem:[#allocation7 + $0x90] ss:$8 sps:$4 sm:$0xff]  }
 0x2e1   :  { %v1079_v14 = vpop.f32.mrf.mxu0  ;;  %v2313_v18 = vld [vmem:[#allocation7 + $0x74] ss:$8 sps:$4 sm:$0xff]  }
 0x2e2   :  { %v1109_v56 = vpack.c.bf16 %v1076_v46, %v1072_v17  ;;  %1423 = vmatpush2.bf16.msra.mxu1 %v2966_v19  ;;  %v1080_v23 = vadd.f32 %v1079_v14, %v2886_v34  ;;  %v3007_v17 = vld [vmem:[#allocation7 + $0x84] ss:$8 sps:$4 sm:$0xff]   ;;  %v3010_v46 = vld [vmem:[#allocation7 + $0x80] ss:$8 sps:$4 sm:$0xff]  }
 0x2e3   :  { %v1081_v50 = vpop.f32.mrf.mxu0  ;;  %1424 = vmatprep.subr.bf16.mxu1 %v2969_v1 }
 0x2e4   :  { %1196 = vmatprep.mubr.bf16.mxu1 %v1109_v56  ;;  %v1082_v2 = vadd.f32 %v1081_v50, %v2883_v40 }
 0x2e5   :  { %v1083_v13 = vpop.f32.mrf.mxu0  ;;  %1197 = vmatmul.mubr.bf16.gmra.mxu1 %v1108_v24 }
 0x2e6   :  { %1425 = vmatpush2.bf16.msra.mxu1 %v2972_v29  ;;  %v1084_v12 = vadd.f32 %v1083_v13, %v2886_v34 }
 0x2e7   :  { %v1085_v33 = vpop.f32.mrf.mxu0  ;;  %1426 = vmatprep.subr.bf16.mxu1 %v2976_v21 }
 0x2e8   :  { %v1086_v7 = vadd.f32 %v1085_v33, %v2883_v40  ;;  %v1110_v6 = vpack.c.bf16 %v1084_v12, %v1080_v23 }
 0x2e9   :  { %v1089_v9 = vpop.f32.mrf.mxu0 }
 0x2ea   :  { %v1111_v11 = vpack.c.bf16 %v1086_v7, %v1082_v2  ;;  %1427 = vmatpush2.bf16.msra.mxu1 %v2982_v25  ;;  %v1090_v58 = vadd.f32 %v1089_v9, %v2886_v34 }
 0x2eb   :  { %v1091_v37 = vpop.f32.mrf.mxu0  ;;  %1428 = vmatprep.subr.bf16.mxu1 %v2985_v4 }
 0x2ec   :  { %1206 = vmatprep.mubr.bf16.mxu1 %v1111_v11  ;;  %v1092_v16 = vadd.f32 %v1091_v37, %v2883_v40 }
 0x2ed   :  { %v1093_v5 = vpop.f32.mrf.mxu0  ;;  %1207 = vmatmul.mubr.bf16.gmra.mxu1 %v1110_v6 }
 0x2ee   :  { %1429 = vmatpush2.bf16.msra.mxu1 %v2988_v41  ;;  %v1094_v15 = vadd.f32 %v1093_v5, %v2886_v34 }
 0x2ef   :  { %v1095_v27 = vpop.f32.mrf.mxu0  ;;  %1430 = vmatprep.subr.bf16.mxu1 %v2992_v57 }
 0x2f0   :  { %v1096_v28 = vadd.f32 %v1095_v27, %v2883_v40  ;;  %v1112_v49 = vpack.c.bf16 %v1094_v15, %v1090_v58 }
 0x2f2   :  { %v1113_v59 = vpack.c.bf16 %v1096_v28, %v1092_v16  ;;  %1431 = vmatpush2.bf16.msra.mxu1 %v2998_v44 }
 0x2f3   :  { %1432 = vmatprep.subr.bf16.mxu1 %v3001_v61 }
 0x2f4   :  { %1216 = vmatprep.mubr.bf16.mxu1 %v1113_v59 }
 0x2f5   :  { %1217 = vmatmul.mubr.bf16.gmra.mxu1 %v1112_v49 }
 0x2f6   :  { %1433 = vmatpush2.bf16.msra.mxu1 %v3004_v30 }
 0x2f7   :  { %1434 = vmatprep.subr.bf16.mxu1 %v3007_v17 }
 0x2fa   :  { %1435 = vmatpush2.bf16.msra.mxu1 %v3010_v46 }
 0x2fb   :  { %1694 = vmatprep.subr.bf16.mxu1 %v2313_v18  ;;  %v3021_v18 = vld [vmem:[#allocation8 + $0x70] ss:$8 sps:$4 sm:$0xff]  }
 0x37d   :  { %v1148_v14 = vpop.f32.mrf.mxu1 }
 0x37e   :  { %v1149_v12 = vadd.f32 %v1148_v14, %v2813_v22 }
 0x37f   :  { %v1150_v56 = vpop.f32.mrf.mxu1 }
 0x380   :  { %v1151_v50 = vadd.f32 %v1150_v56, %v2810_v20  ;;  %v1227_v6 = vmax.f32 %v1149_v12, 0.0 }
 0x381   :  { %v1152_v24 = vpop.f32.mrf.mxu1 }
 0x382   :  { %v1153_v13 = vadd.f32 %v1152_v24, %v2813_v22  ;;  %v1228_v9 = vmax.f32 %v1151_v50, 0.0  ;;  %v3024_v24 = vld [vmem:[#allocation8 + $0x64] ss:$8 sps:$4 sm:$0xff]  }
 0x383   :  { %v1154_v33 = vpop.f32.mrf.mxu1 }
 0x384   :  { %v1155_v2 = vadd.f32 %v1154_v33, %v2810_v20  ;;  %v1229_v7 = vmax.f32 %v1153_v13, 0.0 }
 0x385   :  { %v1158_v23 = vpop.f32.mrf.mxu1 }
 0x386   :  { %v1230_v11 = vmax.f32 %v1155_v2, 0.0  ;;  %v1259_v15 = vpack.c.bf16 %v1229_v7, %v1227_v6  ;;  %v1159_v58 = vadd.f32 %v1158_v23, %v2813_v22  ;;  %v3027_v7 = vld [vmem:[#allocation8 + $0x60] ss:$8 sps:$4 sm:$0xff]  }
 0x387   :  { %v1160_v37 = vpop.f32.mrf.mxu1 }
 0x388   :  { %v1260_v5 = vpack.c.bf16 %v1230_v11, %v1228_v9  ;;  %v1161_v16 = vadd.f32 %v1160_v37, %v2810_v20  ;;  %v1231_v12 = vmax.f32 %v1159_v58, 0.0  ;;  %v3030_v11 = vld [vmem:[#allocation8 + $0x54] ss:$8 sps:$4 sm:$0xff]  }
 0x389   :  { %v1162_v27 = vpop.f32.mrf.mxu1 }
 0x38a   :  { %v1163_v28 = vadd.f32 %v1162_v27, %v2813_v22  ;;  %1307 = vmatprep.mubr.bf16.mxu0 %v1260_v5  ;;  %v1232_v50 = vmax.f32 %v1161_v16, 0.0  ;;  %v3037_v16 = vld [vmem:[#allocation8 + $0x50] ss:$8 sps:$4 sm:$0xff]  }
 0x38b   :  { %v1164_v59 = vpop.f32.mrf.mxu1  ;;  %1308 = vmatmul.mubr.bf16.vlgmr.msra.gmra.mxu0 %v1259_v15 }
 0x38c   :  { %v1165_v49 = vadd.f32 %v1164_v59, %v2810_v20  ;;  %1566 = vmatpush1.bf16.msra.mxu0 %v3021_v18  ;;  %v1233_v14 = vmax.f32 %v1163_v28, 0.0  ;;  %v3040_v59 = vld [vmem:[#allocation8 + $0x44] ss:$8 sps:$4 sm:$0xff]  }
 0x38d   :  { %v1168_v56 = vpop.f32.mrf.mxu1  ;;  %1567 = vmatprep.subr.bf16.mxu0 %v3024_v24 }
 0x38e   :  { %v1234_v13 = vmax.f32 %v1165_v49, 0.0  ;;  %v1261_v23 = vpack.c.bf16 %v1233_v14, %v1231_v12  ;;  %v1169_v5 = vadd.f32 %v1168_v56, %v2813_v22  ;;  %v3043_v56 = vld [vmem:[#allocation8 + $0x40] ss:$8 sps:$4 sm:$0xff]  }
 0x38f   :  { %v1170_v33 = vpop.f32.mrf.mxu1  ;;  %3486 = vst [vmem:[#allocation15_spill] sm:$0xff] %v3043_v56 }
 0x390   :  { %v1262_v2 = vpack.c.bf16 %v1234_v13, %v1232_v50  ;;  %1568 = vmatpush1.bf16.msra.mxu0 %v3027_v7  ;;  %v1171_v6 = vadd.f32 %v1170_v33, %v2810_v20  ;;  %v1235_v50 = vmax.f32 %v1169_v5, 0.0 }
 0x391   :  { %v1172_v9 = vpop.f32.mrf.mxu1  ;;  %1569 = vmatprep.subr.bf16.mxu0 %v3030_v11 }
 0x392   :  { %v1173_v37 = vadd.f32 %v1172_v9, %v2813_v22  ;;  %1317 = vmatprep.mubr.bf16.mxu0 %v1262_v2  ;;  %v1236_v49 = vmax.f32 %v1171_v6, 0.0 }
 0x393   :  { %v1174_v15 = vpop.f32.mrf.mxu1  ;;  %1318 = vmatmul.mubr.bf16.gmra.mxu0 %v1261_v23  ;;  %v3046_v23 = vld [vmem:[#allocation8 + $0x34] ss:$8 sps:$4 sm:$0xff]  }
 0x394   :  { %v1175_v27 = vadd.f32 %v1174_v15, %v2810_v20  ;;  %1570 = vmatpush1.bf16.msra.mxu0 %v3037_v16  ;;  %v1237_v28 = vmax.f32 %v1173_v37, 0.0  ;;  %3487 = vst [vmem:[#allocation16_spill] sm:$0xff] %v3046_v23 }
 0x395   :  { %v1178_v58 = vpop.f32.mrf.mxu1  ;;  %1571 = vmatprep.subr.bf16.mxu0 %v3040_v59 }
 0x396   :  { %v1238_v14 = vmax.f32 %v1175_v27, 0.0  ;;  %v1263_v33 = vpack.c.bf16 %v1237_v28, %v1235_v50  ;;  %v1179_v6 = vadd.f32 %v1178_v58, %v2813_v22  ;;  %v3053_v27 = vld [vmem:[#allocation8 + $0x30] ss:$8 sps:$4 sm:$0xff]   ;;  %v3059_v58 = vld [vmem:[#allocation8 + $0x20] ss:$8 sps:$4 sm:$0xff]  }
 0x397   :  { %v1180_v13 = vpop.f32.mrf.mxu1  ;;  %3488 = vst [vmem:[#allocation17_spill] sm:$0xff] %v3053_v27  ;;  %3490 = vst [vmem:[#allocation19_spill] sm:$0xff] %v3059_v58 }
 0x398   :  { %v1264_v12 = vpack.c.bf16 %v1238_v14, %v1236_v49  ;;  %1572 = vmatpush1.bf16.msra.mxu0 %v3043_v56  ;;  %v1181_v9 = vadd.f32 %v1180_v13, %v2810_v20  ;;  %v3056_v14 = vld [vmem:[#allocation8 + $0x24] ss:$8 sps:$4 sm:$0xff]   ;;  %v3062_v56 = vld [vmem:[#allocation8 + $0x14] ss:$8 sps:$4 sm:$0xff]  }
 0x399   :  { %v1182_v2 = vpop.f32.mrf.mxu1  ;;  %1573 = vmatprep.subr.bf16.mxu0 %v3046_v23  ;;  %3489 = vst [vmem:[#allocation18_spill] sm:$0xff] %v3056_v14  ;;  %3491 = vst [vmem:[#allocation20_spill] sm:$0xff] %v3062_v56 }
 0x39a   :  { %v1183_v37 = vadd.f32 %v1182_v2, %v2813_v22  ;;  %1327 = vmatprep.mubr.bf16.mxu0 %v1264_v12  ;;  %v1240_v50 = vmax.f32 %v1181_v9, 0.0  ;;  %v1239_v2 = vmax.f32 %v1179_v6, 0.0 }
 0x39b   :  { %v1184_v5 = vpop.f32.mrf.mxu1  ;;  %1328 = vmatmul.mubr.bf16.gmra.mxu0 %v1263_v33 }
 0x39c   :  { %v1185_v15 = vadd.f32 %v1184_v5, %v2810_v20  ;;  %1574 = vmatpush1.bf16.msra.mxu0 %v3053_v27  ;;  %v1241_v28 = vmax.f32 %v1183_v37, 0.0 }
 0x39d   :  { %v1188_v49 = vpop.f32.mrf.mxu1  ;;  %1575 = vmatprep.subr.bf16.mxu0 %v3056_v14  ;;  %v3078_v14 = vld [vmem:[#allocation8 + $0xf4] ss:$8 sps:$4 sm:$0xff]  }
 0x39e   :  { %v1242_v13 = vmax.f32 %v1185_v15, 0.0  ;;  %v1265_v33 = vpack.c.bf16 %v1241_v28, %v1239_v2  ;;  %v1189_v9 = vadd.f32 %v1188_v49, %v2813_v22  ;;  %v3072_v2 = vld [vmem:[#allocation8 + $0x4] ss:$8 sps:$4 sm:$0xff]   ;;  %v3075_v49 = vld [vmem:[#allocation8] ss:$8 sps:$4 sm:$0xff]   ;;  %3495 = vst [vmem:[#allocation24_spill] sm:$0xff] %v3078_v14 }
 0x39f   :  { %v1190_v12 = vpop.f32.mrf.mxu1  ;;  %3493 = vst [vmem:[#allocation22_spill] sm:$0xff] %v3072_v2  ;;  %3494 = vst [vmem:[#allocation23_spill] sm:$0xff] %v3075_v49 }
 0x3a0   :  { %v1266_v23 = vpack.c.bf16 %v1242_v13, %v1240_v50  ;;  %1576 = vmatpush1.bf16.msra.mxu0 %v3059_v58  ;;  %v1191_v37 = vadd.f32 %v1190_v12, %v2810_v20  ;;  %v3069_v50 = vld [vmem:[#allocation8 + $0x10] ss:$8 sps:$4 sm:$0xff]  }
 0x3a1   :  { %v1192_v5 = vpop.f32.mrf.mxu1  ;;  %1577 = vmatprep.subr.bf16.mxu0 %v3062_v56  ;;  %3492 = vst [vmem:[#allocation21_spill] sm:$0xff] %v3069_v50 }
 0x3a2   :  { %v1193_v27 = vadd.f32 %v1192_v5, %v2813_v22  ;;  %1337 = vmatprep.mubr.bf16.mxu0 %v1266_v23  ;;  %v1244_v12 = vmax.f32 %v1191_v37, 0.0  ;;  %v1243_v5 = vmax.f32 %v1189_v9, 0.0 }
 0x3a3   :  { %v1194_v6 = vpop.f32.mrf.mxu1  ;;  %1338 = vmatmul.mubr.bf16.gmra.mxu0 %v1265_v33 }
 0x3a4   :  { %v1195_v15 = vadd.f32 %v1194_v6, %v2810_v20  ;;  %1578 = vmatpush1.bf16.msra.mxu0 %v3069_v50  ;;  %v1245_v28 = vmax.f32 %v1193_v27, 0.0 }
 0x3a5   :  { %v1198_v13 = vpop.f32.mrf.mxu1  ;;  %1579 = vmatprep.subr.bf16.mxu0 %v3072_v2  ;;  %v3094_v2 = vld [vmem:[#allocation8 + $0xd4] ss:$8 sps:$4 sm:$0xff]  }
 0x3a6   :  { %v1246_v56 = vmax.f32 %v1195_v15, 0.0  ;;  %v1267_v33 = vpack.c.bf16 %v1245_v28, %v1243_v5  ;;  %v1199_v37 = vadd.f32 %v1198_v13, %v2813_v22  ;;  %v3085_v15 = vld [vmem:[#allocation8 + $0xf0] ss:$8 sps:$4 sm:$0xff]   ;;  %v3088_v5 = vld [vmem:[#allocation8 + $0xe4] ss:$8 sps:$4 sm:$0xff]   ;;  %3499 = vst [vmem:[#allocation28_spill] sm:$0xff] %v3094_v2 }
 0x3a7   :  { %v1200_v23 = vpop.f32.mrf.mxu1  ;;  %3496 = vst [vmem:[#allocation25_spill] sm:$0xff] %v3085_v15  ;;  %3497 = vst [vmem:[#allocation26_spill] sm:$0xff] %v3088_v5  ;;  %v3091_v13 = vld [vmem:[#allocation8 + $0xe0] ss:$8 sps:$4 sm:$0xff]  }
 0x3a8   :  { %v1268_v58 = vpack.c.bf16 %v1246_v56, %v1244_v12  ;;  %1580 = vmatpush1.bf16.msra.mxu0 %v3075_v49  ;;  %v1201_v27 = vadd.f32 %v1200_v23, %v2810_v20  ;;  %3498 = vst [vmem:[#allocation27_spill] sm:$0xff] %v3091_v13 }
 0x3a9   :  { %v1202_v6 = vpop.f32.mrf.mxu1  ;;  %1581 = vmatprep.subr.bf16.mxu0 %v3078_v14 }
 0x3aa   :  { %v1203_v50 = vadd.f32 %v1202_v6, %v2813_v22  ;;  %1347 = vmatprep.mubr.bf16.mxu0 %v1268_v58  ;;  %v1248_v23 = vmax.f32 %v1201_v27, 0.0  ;;  %v1247_v6 = vmax.f32 %v1199_v37, 0.0 }
 0x3ab   :  { %v1204_v9 = vpop.f32.mrf.mxu1  ;;  %1348 = vmatmul.mubr.bf16.gmra.mxu0 %v1267_v33 }
 0x3ac   :  { %v1205_v56 = vadd.f32 %v1204_v9, %v2810_v20  ;;  %1582 = vmatpush2.bf16.msra.mxu0 %v3085_v15  ;;  %v1249_v28 = vmax.f32 %v1203_v50, 0.0 }
 0x3ad   :  { %v1208_v12 = vpop.f32.mrf.mxu1  ;;  %1583 = vmatprep.subr.bf16.mxu0 %v3088_v5  ;;  %v3110_v5 = vld [vmem:[#allocation8 + $0xb4] ss:$8 sps:$4 sm:$0xff]  }
 0x3ae   :  { %v1250_v14 = vmax.f32 %v1205_v56, 0.0  ;;  %v1269_v33 = vpack.c.bf16 %v1249_v28, %v1247_v6  ;;  %v1209_v27 = vadd.f32 %v1208_v12, %v2813_v22  ;;  %v3101_v56 = vld [vmem:[#allocation8 + $0xd0] ss:$8 sps:$4 sm:$0xff]   ;;  %v3104_v6 = vld [vmem:[#allocation8 + $0xc4] ss:$8 sps:$4 sm:$0xff]   ;;  %3501 = vst [vmem:[#allocation30_spill] sm:$0xff] %v3110_v5 }
 0x3af   :  { %v1210_v58 = vpop.f32.mrf.mxu1  ;;  %3500 = vst [vmem:[#allocation29_spill] sm:$0xff] %v3101_v56  ;;  %v3107_v12 = vld [vmem:[#allocation8 + $0xc0] ss:$8 sps:$4 sm:$0xff]  }
 0x3b0   :  { %v1270_v49 = vpack.c.bf16 %v1250_v14, %v1248_v23  ;;  %1584 = vmatpush2.bf16.msra.mxu0 %v3091_v13  ;;  %v1211_v50 = vadd.f32 %v1210_v58, %v2810_v20 }
 0x3b1   :  { %v1212_v9 = vpop.f32.mrf.mxu1  ;;  %1585 = vmatprep.subr.bf16.mxu0 %v3094_v2 }
 0x3b2   :  { %v1213_v15 = vadd.f32 %v1212_v9, %v2813_v22  ;;  %1357 = vmatprep.mubr.bf16.mxu0 %v1270_v49  ;;  %v1252_v58 = vmax.f32 %v1211_v50, 0.0  ;;  %v1251_v9 = vmax.f32 %v1209_v27, 0.0 }
 0x3b3   :  { %v1214_v37 = vpop.f32.mrf.mxu1  ;;  %1358 = vmatmul.mubr.bf16.gmra.mxu0 %v1269_v33 }
 0x3b4   :  { %v1215_v14 = vadd.f32 %v1214_v37, %v2810_v20  ;;  %1586 = vmatpush2.bf16.msra.mxu0 %v3101_v56  ;;  %v1253_v28 = vmax.f32 %v1213_v15, 0.0 }
 0x3b5   :  { %v1218_v23 = vpop.f32.mrf.mxu1  ;;  %1587 = vmatprep.subr.bf16.mxu0 %v3104_v6 }
 0x3b6   :  { %v1254_v2 = vmax.f32 %v1215_v14, 0.0  ;;  %v1271_v33 = vpack.c.bf16 %v1253_v28, %v1251_v9  ;;  %v1219_v50 = vadd.f32 %v1218_v23, %v2813_v22  ;;  %v3117_v14 = vld [vmem:[#allocation8 + $0xb0] ss:$8 sps:$4 sm:$0xff]  }
 0x3b7   :  { %v1220_v49 = vpop.f32.mrf.mxu1 }
 0x3b8   :  { %v1272_v13 = vpack.c.bf16 %v1254_v2, %v1252_v58  ;;  %1588 = vmatpush2.bf16.msra.mxu0 %v3107_v12  ;;  %v1221_v15 = vadd.f32 %v1220_v49, %v2810_v20 }
 0x3b9   :  { %v1222_v37 = vpop.f32.mrf.mxu1  ;;  %1589 = vmatprep.subr.bf16.mxu0 %v3110_v5  ;;  %v1255_v5 = vmax.f32 %v1219_v50, 0.0 }
 0x3ba   :  { %v1223_v56 = vadd.f32 %v1222_v37, %v2813_v22  ;;  %1367 = vmatprep.mubr.bf16.mxu0 %v1272_v13  ;;  %v1256_v58 = vmax.f32 %v1221_v15, 0.0 }
 0x3bb   :  { %v1224_v27 = vpop.f32.mrf.mxu1  ;;  %1368 = vmatmul.mubr.bf16.gmra.mxu0 %v1271_v33 }
 0x3bc   :  { %v1225_v2 = vadd.f32 %v1224_v27, %v2810_v20  ;;  %1590 = vmatpush2.bf16.msra.mxu0 %v3117_v14  ;;  %v1257_v28 = vmax.f32 %v1223_v56, 0.0  ;;  %v3126_v56 = vld [vmem:[#allocation8 + $0x74] ss:$8 sps:$4 sm:$0xff]  }
 0x3bd   :  { %1591 = vmatprep.subr.bf16.mxu0 %v2787_v47 }
 0x3be   :  { %v1258_v9 = vmax.f32 %v1225_v2, 0.0  ;;  %v1273_v13 = vpack.c.bf16 %v1257_v28, %v1255_v5 }
 0x3c0   :  { %v1274_v49 = vpack.c.bf16 %v1258_v9, %v1256_v58  ;;  %1592 = vmatpush2.bf16.msra.mxu0 %v2789_v51 }
 0x3c1   :  { %1593 = vmatprep.subr.bf16.mxu0 %v2793_v52 }
 0x3c2   :  { %1377 = vmatprep.mubr.bf16.mxu0 %v1274_v49 }
 0x3c3   :  { %1378 = vmatmul.mubr.bf16.gmra.mxu0 %v1273_v13 }
 0x3c4   :  { %1594 = vmatpush2.bf16.msra.mxu0 %v2795_v53 }
 0x3c5   :  { %1595 = vmatprep.subr.bf16.mxu0 %v2799_v54 }
 0x3c8   :  { %1596 = vmatpush2.bf16.msra.mxu0 %v2801_v55 }
 0x3c9   :  { %1855 = vmatprep.subr.bf16.mxu0 %v3126_v56 }
 0x44b   :  { %v1309_v47 = vpop.f32.mrf.mxu0 }
 0x44c   :  { %v1310_v53 = vadd.f32 %v1309_v47, %v2886_v34 }
 0x44d   :  { %v1311_v23 = vpop.f32.mrf.mxu0 }
 0x44e   :  { %v1312_v52 = vadd.f32 %v1311_v23, %v2883_v40 }
 0x44f   :  { %v1313_v33 = vpop.f32.mrf.mxu0 }
 0x450   :  { %v1314_v51 = vadd.f32 %v1313_v33, %v2886_v34 }
 0x451   :  { %v1315_v5 = vpop.f32.mrf.mxu0 }
 0x452   :  { %v1316_v37 = vadd.f32 %v1315_v5, %v2883_v40  ;;  %v1388_v50 = vpack.c.bf16 %v1314_v51, %v1310_v53 }
 0x453   :  { %v1319_v15 = vpop.f32.mrf.mxu0 }
 0x454   :  { %v1389_v54 = vpack.c.bf16 %v1316_v37, %v1312_v52  ;;  %v1320_v49 = vadd.f32 %v1319_v15, %v2886_v34 }
 0x455   :  { %v1321_v55 = vpop.f32.mrf.mxu0 }
 0x456   :  { %1436 = vmatprep.mubr.bf16.mxu1 %v1389_v54  ;;  %v1322_v58 = vadd.f32 %v1321_v55, %v2883_v40 }
 0x457   :  { %v1323_v27 = vpop.f32.mrf.mxu0  ;;  %1437 = vmatmul.mubr.bf16.vlgmr.msra.gmra.mxu1 %v1388_v50 }
 0x458   :  { %1695 = vmatpush1.bf16.msra.mxu1 %v2892_v42  ;;  %v1324_v2 = vadd.f32 %v1323_v27, %v2886_v34 }
 0x459   :  { %v1325_v28 = vpop.f32.mrf.mxu0  ;;  %1696 = vmatprep.subr.bf16.mxu1 %v2896_v60 }
 0x45a   :  { %v1326_v9 = vadd.f32 %v1325_v28, %v2883_v40  ;;  %v1390_v23 = vpack.c.bf16 %v1324_v2, %v1320_v49 }
 0x45b   :  { %v1329_v13 = vpop.f32.mrf.mxu0 }
 0x45c   :  { %v1391_v47 = vpack.c.bf16 %v1326_v9, %v1322_v58  ;;  %1697 = vmatpush1.bf16.msra.mxu1 %v2902_v31  ;;  %v1330_v31 = vadd.f32 %v1329_v13, %v2886_v34 }
 0x45d   :  { %v1331_v33 = vpop.f32.mrf.mxu0  ;;  %1698 = vmatprep.subr.bf16.mxu1 %v2905_v62 }
 0x45e   :  { %1446 = vmatprep.mubr.bf16.mxu1 %v1391_v47  ;;  %v1332_v5 = vadd.f32 %v1331_v33, %v2883_v40 }
 0x45f   :  { %v1333_v42 = vpop.f32.mrf.mxu0  ;;  %1447 = vmatmul.mubr.bf16.gmra.mxu1 %v1390_v23 }
 0x460   :  { %1699 = vmatpush1.bf16.msra.mxu1 %v2908_v63  ;;  %v1334_v60 = vadd.f32 %v1333_v42, %v2886_v34 }
 0x461   :  { %v1335_v51 = vpop.f32.mrf.mxu0  ;;  %1700 = vmatprep.subr.bf16.mxu1 %v2912_v0 }
 0x462   :  { %v1336_v52 = vadd.f32 %v1335_v51, %v2883_v40  ;;  %v1392_v62 = vpack.c.bf16 %v1334_v60, %v1330_v31 }
 0x463   :  { %v1339_v37 = vpop.f32.mrf.mxu0 }
 0x464   :  { %v1393_v53 = vpack.c.bf16 %v1336_v52, %v1332_v5  ;;  %1701 = vmatpush1.bf16.msra.mxu1 %v2918_v32  ;;  %v1340_v32 = vadd.f32 %v1339_v37, %v2886_v34 }
 0x465   :  { %v1341_v15 = vpop.f32.mrf.mxu0  ;;  %1702 = vmatprep.subr.bf16.mxu1 %v2921_v8 }
 0x466   :  { %1456 = vmatprep.mubr.bf16.mxu1 %v1393_v53  ;;  %v1342_v50 = vadd.f32 %v1341_v15, %v2883_v40 }
 0x467   :  { %v1343_v63 = vpop.f32.mrf.mxu0  ;;  %1457 = vmatmul.mubr.bf16.gmra.mxu1 %v1392_v62 }
 0x468   :  { %1703 = vmatpush1.bf16.msra.mxu1 %v2924_v35  ;;  %v1344_v0 = vadd.f32 %v1343_v63, %v2886_v34 }
 0x469   :  { %v1345_v54 = vpop.f32.mrf.mxu0  ;;  %1704 = vmatprep.subr.bf16.mxu1 %v2928_v36 }
 0x46a   :  { %v1346_v55 = vadd.f32 %v1345_v54, %v2883_v40  ;;  %v1394_v8 = vpack.c.bf16 %v1344_v0, %v1340_v32 }
 0x46b   :  { %v1349_v27 = vpop.f32.mrf.mxu0 }
 0x46c   :  { %v1395_v2 = vpack.c.bf16 %v1346_v55, %v1342_v50  ;;  %1705 = vmatpush1.bf16.msra.mxu1 %v2934_v26  ;;  %v1350_v26 = vadd.f32 %v1349_v27, %v2886_v34 }
 0x46d   :  { %v1351_v28 = vpop.f32.mrf.mxu0  ;;  %1706 = vmatprep.subr.bf16.mxu1 %v2937_v38 }
 0x46e   :  { %1466 = vmatprep.mubr.bf16.mxu1 %v1395_v2  ;;  %v1352_v9 = vadd.f32 %v1351_v28, %v2883_v40 }
 0x46f   :  { %v1353_v35 = vpop.f32.mrf.mxu0  ;;  %1467 = vmatmul.mubr.bf16.gmra.mxu1 %v1394_v8 }
 0x470   :  { %1707 = vmatpush1.bf16.msra.mxu1 %v2940_v10  ;;  %v1354_v36 = vadd.f32 %v1353_v35, %v2886_v34 }
 0x471   :  { %v1355_v58 = vpop.f32.mrf.mxu0  ;;  %1708 = vmatprep.subr.bf16.mxu1 %v2944_v39 }
 0x472   :  { %v1356_v49 = vadd.f32 %v1355_v58, %v2883_v40  ;;  %v1396_v38 = vpack.c.bf16 %v1354_v36, %v1350_v26 }
 0x473   :  { %v1359_v13 = vpop.f32.mrf.mxu0 }
 0x474   :  { %v1397_v47 = vpack.c.bf16 %v1356_v49, %v1352_v9  ;;  %1709 = vmatpush1.bf16.msra.mxu1 %v2950_v3  ;;  %v1360_v3 = vadd.f32 %v1359_v13, %v2886_v34 }
 0x475   :  { %v1361_v23 = vpop.f32.mrf.mxu0  ;;  %1710 = vmatprep.subr.bf16.mxu1 %v2953_v48 }
 0x476   :  { %1476 = vmatprep.mubr.bf16.mxu1 %v1397_v47  ;;  %v1362_v42 = vadd.f32 %v1361_v23, %v2883_v40 }
 0x477   :  { %v1363_v10 = vpop.f32.mrf.mxu0  ;;  %1477 = vmatmul.mubr.bf16.gmra.mxu1 %v1396_v38 }
 0x478   :  { %1711 = vmatpush2.bf16.msra.mxu1 %v2956_v43  ;;  %v1364_v39 = vadd.f32 %v1363_v10, %v2886_v34 }
 0x479   :  { %v1365_v33 = vpop.f32.mrf.mxu0  ;;  %1712 = vmatprep.subr.bf16.mxu1 %v2960_v45 }
 0x47a   :  { %v1366_v60 = vadd.f32 %v1365_v33, %v2883_v40  ;;  %v1398_v48 = vpack.c.bf16 %v1364_v39, %v1360_v3 }
 0x47b   :  { %v1369_v51 = vpop.f32.mrf.mxu0 }
 0x47c   :  { %v1399_v5 = vpack.c.bf16 %v1366_v60, %v1362_v42  ;;  %1713 = vmatpush2.bf16.msra.mxu1 %v2966_v19  ;;  %v1370_v19 = vadd.f32 %v1369_v51, %v2886_v34 }
 0x47d   :  { %v1371_v52 = vpop.f32.mrf.mxu0  ;;  %1714 = vmatprep.subr.bf16.mxu1 %v2969_v1 }
 0x47e   :  { %1486 = vmatprep.mubr.bf16.mxu1 %v1399_v5  ;;  %v1372_v37 = vadd.f32 %v1371_v52, %v2883_v40 }
 0x47f   :  { %v1373_v43 = vpop.f32.mrf.mxu0  ;;  %1487 = vmatmul.mubr.bf16.gmra.mxu1 %v1398_v48 }
 0x480   :  { %1715 = vmatpush2.bf16.msra.mxu1 %v2972_v29  ;;  %v1374_v45 = vadd.f32 %v1373_v43, %v2886_v34 }
 0x481   :  { %v1375_v31 = vpop.f32.mrf.mxu0  ;;  %1716 = vmatprep.subr.bf16.mxu1 %v2976_v21 }
 0x482   :  { %v1376_v53 = vadd.f32 %v1375_v31, %v2883_v40  ;;  %v1400_v1 = vpack.c.bf16 %v1374_v45, %v1370_v19 }
 0x483   :  { %v1379_v62 = vpop.f32.mrf.mxu0 }
 0x484   :  { %v1401_v15 = vpack.c.bf16 %v1376_v53, %v1372_v37  ;;  %1717 = vmatpush2.bf16.msra.mxu1 %v2982_v25  ;;  %v1380_v25 = vadd.f32 %v1379_v62, %v2886_v34 }
 0x485   :  { %v1381_v63 = vpop.f32.mrf.mxu0  ;;  %1718 = vmatprep.subr.bf16.mxu1 %v2985_v4 }
 0x486   :  { %1496 = vmatprep.mubr.bf16.mxu1 %v1401_v15  ;;  %v1382_v54 = vadd.f32 %v1381_v63, %v2883_v40 }
 0x487   :  { %v1383_v29 = vpop.f32.mrf.mxu0  ;;  %1497 = vmatmul.mubr.bf16.gmra.mxu1 %v1400_v1 }
 0x488   :  { %1719 = vmatpush2.bf16.msra.mxu1 %v2988_v41  ;;  %v1384_v21 = vadd.f32 %v1383_v29, %v2886_v34  ;;  %v3502_v29 = vld [vmem:[#allocation15_spill] sm:$0xff] }
 0x489   :  { %v1385_v0 = vpop.f32.mrf.mxu0  ;;  %1720 = vmatprep.subr.bf16.mxu1 %v2992_v57 }
 0x48a   :  { %v1386_v50 = vadd.f32 %v1385_v0, %v2883_v40  ;;  %v1402_v4 = vpack.c.bf16 %v1384_v21, %v1380_v25 }
 0x48c   :  { %v1403_v55 = vpack.c.bf16 %v1386_v50, %v1382_v54  ;;  %1721 = vmatpush2.bf16.msra.mxu1 %v2998_v44  ;;  %v3503_v54 = vld [vmem:[#allocation16_spill] sm:$0xff] }
 0x48d   :  { %1722 = vmatprep.subr.bf16.mxu1 %v3001_v61 }
 0x48e   :  { %1506 = vmatprep.mubr.bf16.mxu1 %v1403_v55 }
 0x48f   :  { %1507 = vmatmul.mubr.bf16.gmra.mxu1 %v1402_v4 }
 0x490   :  { %1723 = vmatpush2.bf16.msra.mxu1 %v3004_v30 }
 0x491   :  { %1724 = vmatprep.subr.bf16.mxu1 %v3007_v17 }
 0x494   :  { %1725 = vmatpush2.bf16.msra.mxu1 %v3010_v46 }
 0x495   :  { %2110 = vmatprep.subr.bf16.mxu1 %v3126_v56 }
 0x517   :  { %v1438_v41 = vpop.f32.mrf.mxu1 }
 0x518   :  { %v1439_v2 = vadd.f32 %v1438_v41, %v2813_v22 }
 0x519   :  { %v1440_v57 = vpop.f32.mrf.mxu1 }
 0x51a   :  { %v1441_v27 = vadd.f32 %v1440_v57, %v2810_v20  ;;  %v1517_v36 = vmax.f32 %v1439_v2, 0.0  ;;  %v3504_v57 = vld [vmem:[#allocation17_spill] sm:$0xff] }
 0x51b   :  { %v1442_v32 = vpop.f32.mrf.mxu1 }
 0x51c   :  { %v1443_v44 = vadd.f32 %v1442_v32, %v2813_v22  ;;  %v1518_v35 = vmax.f32 %v1441_v27, 0.0 }
 0x51d   :  { %v1444_v61 = vpop.f32.mrf.mxu1 }
 0x51e   :  { %v1445_v8 = vadd.f32 %v1444_v61, %v2810_v20  ;;  %v1519_v28 = vmax.f32 %v1443_v44, 0.0  ;;  %v3505_v44 = vld [vmem:[#allocation18_spill] sm:$0xff] }
 0x51f   :  { %v1448_v30 = vpop.f32.mrf.mxu1 }
 0x520   :  { %v1520_v17 = vmax.f32 %v1445_v8, 0.0  ;;  %v1549_v56 = vpack.c.bf16 %v1519_v28, %v1517_v36  ;;  %v1449_v13 = vadd.f32 %v1448_v30, %v2813_v22 }
 0x521   :  { %v1450_v46 = vpop.f32.mrf.mxu1 }
 0x522   :  { %v1550_v58 = vpack.c.bf16 %v1520_v17, %v1518_v35  ;;  %v1451_v49 = vadd.f32 %v1450_v46, %v2810_v20  ;;  %v1521_v42 = vmax.f32 %v1449_v13, 0.0  ;;  %v3506_v35 = vld [vmem:[#allocation19_spill] sm:$0xff]  ;;  %v3507_v46 = vld [vmem:[#allocation20_spill] sm:$0xff]  ;;  %v3508_v13 = vld [vmem:[#allocation21_spill] sm:$0xff] }
 0x523   :  { %v1452_v9 = vpop.f32.mrf.mxu1 }
 0x524   :  { %v1453_v26 = vadd.f32 %v1452_v9, %v2813_v22  ;;  %1597 = vmatprep.mubr.bf16.mxu0 %v1550_v58  ;;  %v1522_v39 = vmax.f32 %v1451_v49, 0.0 }
 0x525   :  { %v1454_v47 = vpop.f32.mrf.mxu1  ;;  %1598 = vmatmul.mubr.bf16.vlgmr.msra.gmra.mxu0 %v1549_v56 }
 0x526   :  { %v1455_v38 = vadd.f32 %v1454_v47, %v2810_v20  ;;  %1856 = vmatpush1.bf16.msra.mxu0 %v3021_v18  ;;  %v1523_v23 = vmax.f32 %v1453_v26, 0.0 }
 0x527   :  { %v1458_v10 = vpop.f32.mrf.mxu1  ;;  %1857 = vmatprep.subr.bf16.mxu0 %v3024_v24 }
 0x528   :  { %v1524_v33 = vmax.f32 %v1455_v38, 0.0  ;;  %v1551_v51 = vpack.c.bf16 %v1523_v23, %v1521_v42  ;;  %v1459_v43 = vadd.f32 %v1458_v10, %v2813_v22  ;;  %v3509_v23 = vld [vmem:[#allocation22_spill] sm:$0xff] }
 0x529   :  { %v1460_v60 = vpop.f32.mrf.mxu1 }
 0x52a   :  { %v1552_v3 = vpack.c.bf16 %v1524_v33, %v1522_v39  ;;  %1858 = vmatpush1.bf16.msra.mxu0 %v3027_v7  ;;  %v1461_v48 = vadd.f32 %v1460_v60, %v2810_v20  ;;  %v1525_v15 = vmax.f32 %v1459_v43, 0.0 }
 0x52b   :  { %v1462_v5 = vpop.f32.mrf.mxu1  ;;  %1859 = vmatprep.subr.bf16.mxu0 %v3030_v11 }
 0x52c   :  { %v1463_v52 = vadd.f32 %v1462_v5, %v2813_v22  ;;  %1607 = vmatprep.mubr.bf16.mxu0 %v1552_v3  ;;  %v1526_v19 = vmax.f32 %v1461_v48, 0.0  ;;  %v3510_v3 = vld [vmem:[#allocation23_spill] sm:$0xff]  ;;  %v3511_v48 = vld [vmem:[#allocation24_spill] sm:$0xff] }
 0x52d   :  { %v1464_v45 = vpop.f32.mrf.mxu1  ;;  %1608 = vmatmul.mubr.bf16.gmra.mxu0 %v1551_v51 }
 0x52e   :  { %v1465_v31 = vadd.f32 %v1464_v45, %v2810_v20  ;;  %1860 = vmatpush1.bf16.msra.mxu0 %v3037_v16  ;;  %v1527_v37 = vmax.f32 %v1463_v52, 0.0 }
 0x52f   :  { %v1468_v53 = vpop.f32.mrf.mxu1  ;;  %1861 = vmatprep.subr.bf16.mxu0 %v3040_v59 }
 0x530   :  { %v1528_v62 = vmax.f32 %v1465_v31, 0.0  ;;  %v1553_v21 = vpack.c.bf16 %v1527_v37, %v1525_v15  ;;  %v1469_v55 = vadd.f32 %v1468_v53, %v2813_v22  ;;  %v3512_v53 = vld [vmem:[#allocation25_spill] sm:$0xff]  ;;  %v3513_v15 = vld [vmem:[#allocation26_spill] sm:$0xff] }
 0x531   :  { %v1470_v1 = vpop.f32.mrf.mxu1 }
 0x532   :  { %v1554_v63 = vpack.c.bf16 %v1528_v62, %v1526_v19  ;;  %1862 = vmatpush1.bf16.msra.mxu0 %v3502_v29  ;;  %v1471_v50 = vadd.f32 %v1470_v1, %v2810_v20  ;;  %v1529_v8 = vmax.f32 %v1469_v55, 0.0 }
 0x533   :  { %v1472_v0 = vpop.f32.mrf.mxu1  ;;  %1863 = vmatprep.subr.bf16.mxu0 %v3503_v54 }
 0x534   :  { %v1473_v25 = vadd.f32 %v1472_v0, %v2813_v22  ;;  %1617 = vmatprep.mubr.bf16.mxu0 %v1554_v63  ;;  %v1530_v2 = vmax.f32 %v1471_v50, 0.0 }
 0x535   :  { %v1474_v4 = vpop.f32.mrf.mxu1  ;;  %1618 = vmatmul.mubr.bf16.gmra.mxu0 %v1553_v21 }
 0x536   :  { %v1475_v41 = vadd.f32 %v1474_v4, %v2810_v20  ;;  %1864 = vmatpush1.bf16.msra.mxu0 %v3504_v57  ;;  %v1531_v32 = vmax.f32 %v1473_v25, 0.0  ;;  %v3514_v25 = vld [vmem:[#allocation27_spill] sm:$0xff] }
 0x537   :  { %v1478_v27 = vpop.f32.mrf.mxu1  ;;  %1865 = vmatprep.subr.bf16.mxu0 %v3505_v44 }
 0x538   :  { %v1532_v61 = vmax.f32 %v1475_v41, 0.0  ;;  %v1555_v17 = vpack.c.bf16 %v1531_v32, %v1529_v8  ;;  %v1479_v9 = vadd.f32 %v1478_v27, %v2813_v22  ;;  %v3515_v41 = vld [vmem:[#allocation28_spill] sm:$0xff] }
 0x539   :  { %v1480_v28 = vpop.f32.mrf.mxu1 }
 0x53a   :  { %v1556_v30 = vpack.c.bf16 %v1532_v61, %v1530_v2  ;;  %1866 = vmatpush1.bf16.msra.mxu0 %v3506_v35  ;;  %v1481_v58 = vadd.f32 %v1480_v28, %v2810_v20  ;;  %v1533_v33 = vmax.f32 %v1479_v9, 0.0  ;;  %v3516_v28 = vld [vmem:[#allocation29_spill] sm:$0xff] }
 0x53b   :  { %v1482_v36 = vpop.f32.mrf.mxu1  ;;  %1867 = vmatprep.subr.bf16.mxu0 %v3507_v46 }
 0x53c   :  { %v1483_v56 = vadd.f32 %v1482_v36, %v2813_v22  ;;  %1627 = vmatprep.mubr.bf16.mxu0 %v1556_v30  ;;  %v1534_v10 = vmax.f32 %v1481_v58, 0.0 }
 0x53d   :  { %v1484_v49 = vpop.f32.mrf.mxu1  ;;  %1628 = vmatmul.mubr.bf16.gmra.mxu0 %v1555_v17 }
 0x53e   :  { %v1485_v26 = vadd.f32 %v1484_v49, %v2810_v20  ;;  %1868 = vmatpush1.bf16.msra.mxu0 %v3508_v13  ;;  %v1535_v47 = vmax.f32 %v1483_v56, 0.0 }
 0x53f   :  { %v1488_v38 = vpop.f32.mrf.mxu1  ;;  %1869 = vmatprep.subr.bf16.mxu0 %v3509_v23 }
 0x540   :  { %v1536_v39 = vmax.f32 %v1485_v26, 0.0  ;;  %v1557_v51 = vpack.c.bf16 %v1535_v47, %v1533_v33  ;;  %v1489_v45 = vadd.f32 %v1488_v38, %v2813_v22  ;;  %v3517_v38 = vld [vmem:[#allocation30_spill] sm:$0xff] }
 0x541   :  { %v1490_v42 = vpop.f32.mrf.mxu1 }
 0x542   :  { %v1558_v60 = vpack.c.bf16 %v1536_v39, %v1534_v10  ;;  %1870 = vmatpush1.bf16.msra.mxu0 %v3510_v3  ;;  %v1491_v52 = vadd.f32 %v1490_v42, %v2810_v20  ;;  %v1537_v21 = vmax.f32 %v1489_v45, 0.0 }
 0x543   :  { %v1492_v5 = vpop.f32.mrf.mxu1  ;;  %1871 = vmatprep.subr.bf16.mxu0 %v3511_v48 }
 0x544   :  { %v1493_v43 = vadd.f32 %v1492_v5, %v2813_v22  ;;  %1637 = vmatprep.mubr.bf16.mxu0 %v1558_v60  ;;  %v1538_v1 = vmax.f32 %v1491_v52, 0.0  ;;  %v3250_v5 = vld [vmem:[#allocation8 + $0xa4] ss:$8 sps:$4 sm:$0xff]  }
 0x545   :  { %v1494_v31 = vpop.f32.mrf.mxu1  ;;  %1638 = vmatmul.mubr.bf16.gmra.mxu0 %v1557_v51 }
 0x546   :  { %v1495_v37 = vadd.f32 %v1494_v31, %v2810_v20  ;;  %1872 = vmatpush2.bf16.msra.mxu0 %v3512_v53  ;;  %v1539_v19 = vmax.f32 %v1493_v43, 0.0 }
 0x547   :  { %v1498_v62 = vpop.f32.mrf.mxu1  ;;  %1873 = vmatprep.subr.bf16.mxu0 %v3513_v15 }
 0x548   :  { %v1540_v63 = vmax.f32 %v1495_v37, 0.0  ;;  %v1559_v55 = vpack.c.bf16 %v1539_v19, %v1537_v21  ;;  %v1499_v2 = vadd.f32 %v1498_v62, %v2813_v22  ;;  %v3253_v37 = vld [vmem:[#allocation8 + $0xa0] ss:$8 sps:$4 sm:$0xff]   ;;  %v3256_v62 = vld [vmem:[#allocation8 + $0x94] ss:$8 sps:$4 sm:$0xff]  }
 0x549   :  { %v1500_v0 = vpop.f32.mrf.mxu1  ;;  %v3265_v21 = vld [vmem:[#allocation8 + $0x80] ss:$8 sps:$4 sm:$0xff]  }
 0x54a   :  { %v1560_v50 = vpack.c.bf16 %v1540_v63, %v1538_v1  ;;  %1874 = vmatpush2.bf16.msra.mxu0 %v3514_v25  ;;  %v1501_v32 = vadd.f32 %v1500_v0, %v2810_v20  ;;  %v1541_v56 = vmax.f32 %v1499_v2, 0.0  ;;  %v3259_v1 = vld [vmem:[#allocation8 + $0x90] ss:$8 sps:$4 sm:$0xff]   ;;  %v3262_v63 = vld [vmem:[#allocation8 + $0x84] ss:$8 sps:$4 sm:$0xff]  }
 0x54b   :  { %v1502_v4 = vpop.f32.mrf.mxu1  ;;  %1875 = vmatprep.subr.bf16.mxu0 %v3515_v41 }
 0x54c   :  { %v1503_v27 = vadd.f32 %v1502_v4, %v2813_v22  ;;  %1647 = vmatprep.mubr.bf16.mxu0 %v1560_v50  ;;  %v1542_v36 = vmax.f32 %v1501_v32, 0.0 }
 0x54d   :  { %v1504_v61 = vpop.f32.mrf.mxu1  ;;  %1648 = vmatmul.mubr.bf16.gmra.mxu0 %v1559_v55 }
 0x54e   :  { %v1505_v8 = vadd.f32 %v1504_v61, %v2810_v20  ;;  %1876 = vmatpush2.bf16.msra.mxu0 %v3516_v28  ;;  %v1543_v30 = vmax.f32 %v1503_v27, 0.0 }
 0x54f   :  { %v1508_v17 = vpop.f32.mrf.mxu1  ;;  %1877 = vmatprep.subr.bf16.mxu0 %v3104_v6 }
 0x550   :  { %v1544_v58 = vmax.f32 %v1505_v8, 0.0  ;;  %v1561_v26 = vpack.c.bf16 %v1543_v30, %v1541_v56  ;;  %v1509_v33 = vadd.f32 %v1508_v17, %v2813_v22 }
 0x551   :  { %v1510_v9 = vpop.f32.mrf.mxu1 }
 0x552   :  { %v1562_v49 = vpack.c.bf16 %v1544_v58, %v1542_v36  ;;  %1878 = vmatpush2.bf16.msra.mxu0 %v3107_v12  ;;  %v1511_v10 = vadd.f32 %v1510_v9, %v2810_v20  ;;  %v1545_v45 = vmax.f32 %v1509_v33, 0.0 }
 0x553   :  { %v1512_v47 = vpop.f32.mrf.mxu1  ;;  %1879 = vmatprep.subr.bf16.mxu0 %v3517_v38 }
 0x554   :  { %v1513_v39 = vadd.f32 %v1512_v47, %v2813_v22  ;;  %1657 = vmatprep.mubr.bf16.mxu0 %v1562_v49  ;;  %v1546_v52 = vmax.f32 %v1511_v10, 0.0 }
 0x555   :  { %v1514_v42 = vpop.f32.mrf.mxu1  ;;  %1658 = vmatmul.mubr.bf16.gmra.mxu0 %v1561_v26 }
 0x556   :  { %v1515_v60 = vadd.f32 %v1514_v42, %v2810_v20  ;;  %1880 = vmatpush2.bf16.msra.mxu0 %v3117_v14  ;;  %v1547_v51 = vmax.f32 %v1513_v39, 0.0 }
 0x557   :  { %1881 = vmatprep.subr.bf16.mxu0 %v3250_v5 }
 0x558   :  { %v1548_v43 = vmax.f32 %v1515_v60, 0.0  ;;  %v1563_v19 = vpack.c.bf16 %v1547_v51, %v1545_v45 }
 0x55a   :  { %v1564_v31 = vpack.c.bf16 %v1548_v43, %v1546_v52  ;;  %1882 = vmatpush2.bf16.msra.mxu0 %v3253_v37 }
 0x55b   :  { %1883 = vmatprep.subr.bf16.mxu0 %v3256_v62 }
 0x55c   :  { %1667 = vmatprep.mubr.bf16.mxu0 %v1564_v31 }
 0x55d   :  { %1668 = vmatmul.mubr.bf16.gmra.mxu0 %v1563_v19 }
 0x55e   :  { %1884 = vmatpush2.bf16.msra.mxu0 %v3259_v1 }
 0x55f   :  { %1885 = vmatprep.subr.bf16.mxu0 %v3262_v63 }
 0x562   :  { %1886 = vmatpush2.bf16.msra.mxu0 %v3265_v21 }
 0x5e5   :  { %v1599_v0 = vpop.f32.mrf.mxu0 }
 0x5e6   :  { %v1600_v61 = vadd.f32 %v1599_v0, %v2886_v34 }
 0x5e7   :  { %v1601_v50 = vpop.f32.mrf.mxu0 }
 0x5e8   :  { %v1602_v27 = vadd.f32 %v1601_v50, %v2883_v40 }
 0x5e9   :  { %v1603_v55 = vpop.f32.mrf.mxu0 }
 0x5ea   :  { %v1604_v4 = vadd.f32 %v1603_v55, %v2886_v34 }
 0x5eb   :  { %v1605_v32 = vpop.f32.mrf.mxu0 }
 0x5ec   :  { %v1606_v2 = vadd.f32 %v1605_v32, %v2883_v40  ;;  %v1678_v17 = vpack.c.bf16 %v1604_v4, %v1600_v61 }
 0x5ed   :  { %v1609_v8 = vpop.f32.mrf.mxu0 }
 0x5ee   :  { %v1679_v30 = vpack.c.bf16 %v1606_v2, %v1602_v27  ;;  %v1610_v47 = vadd.f32 %v1609_v8, %v2886_v34 }
 0x5ef   :  { %v1611_v36 = vpop.f32.mrf.mxu0 }
 0x5f0   :  { %1726 = vmatprep.mubr.bf16.mxu1 %v1679_v30  ;;  %v1612_v49 = vadd.f32 %v1611_v36, %v2883_v40 }
 0x5f1   :  { %v1613_v58 = vpop.f32.mrf.mxu0  ;;  %1727 = vmatmul.mubr.bf16.vlgmr.msra.gmra.mxu1 %v1678_v17 }
 0x5f2   :  { %2126 = vmatpush1.bf16.msra.mxu1 %v3021_v18  ;;  %v1614_v56 = vadd.f32 %v1613_v58, %v2886_v34 }
 0x5f3   :  { %v1615_v9 = vpop.f32.mrf.mxu0  ;;  %2111 = vmatprep.subr.bf16.mxu1 %v3024_v24 }
 0x5f4   :  { %v1616_v26 = vadd.f32 %v1615_v9, %v2883_v40  ;;  %v1680_v33 = vpack.c.bf16 %v1614_v56, %v1610_v47 }
 0x5f5   :  { %v1619_v10 = vpop.f32.mrf.mxu0 }
 0x5f6   :  { %v1681_v39 = vpack.c.bf16 %v1616_v26, %v1612_v49  ;;  %2127 = vmatpush1.bf16.msra.mxu1 %v3027_v7  ;;  %v1620_v7 = vadd.f32 %v1619_v10, %v2886_v34 }
 0x5f7   :  { %v1621_v42 = vpop.f32.mrf.mxu0  ;;  %2112 = vmatprep.subr.bf16.mxu1 %v3030_v11 }
 0x5f8   :  { %1736 = vmatprep.mubr.bf16.mxu1 %v1681_v39  ;;  %v1622_v51 = vadd.f32 %v1621_v42, %v2883_v40 }
 0x5f9   :  { %v1623_v18 = vpop.f32.mrf.mxu0  ;;  %1737 = vmatmul.mubr.bf16.gmra.mxu1 %v1680_v33 }
 0x5fa   :  { %2128 = vmatpush1.bf16.msra.mxu1 %v3037_v16  ;;  %v1624_v24 = vadd.f32 %v1623_v18, %v2886_v34 }
 0x5fb   :  { %v1625_v60 = vpop.f32.mrf.mxu0  ;;  %2113 = vmatprep.subr.bf16.mxu1 %v3040_v59 }
 0x5fc   :  { %v1626_v52 = vadd.f32 %v1625_v60, %v2883_v40  ;;  %v1682_v11 = vpack.c.bf16 %v1624_v24, %v1620_v7 }
 0x5fd   :  { %v1629_v43 = vpop.f32.mrf.mxu0 }
 0x5fe   :  { %v1683_v45 = vpack.c.bf16 %v1626_v52, %v1622_v51  ;;  %2129 = vmatpush1.bf16.msra.mxu1 %v3502_v29  ;;  %v1630_v29 = vadd.f32 %v1629_v43, %v2886_v34 }
 0x5ff   :  { %v1631_v31 = vpop.f32.mrf.mxu0  ;;  %2114 = vmatprep.subr.bf16.mxu1 %v3503_v54 }
 0x600   :  { %1746 = vmatprep.mubr.bf16.mxu1 %v1683_v45  ;;  %v1632_v0 = vadd.f32 %v1631_v31, %v2883_v40 }
 0x601   :  { %v1633_v16 = vpop.f32.mrf.mxu0  ;;  %1747 = vmatmul.mubr.bf16.gmra.mxu1 %v1682_v11 }
 0x602   :  { %2130 = vmatpush1.bf16.msra.mxu1 %v3504_v57  ;;  %v1634_v59 = vadd.f32 %v1633_v16, %v2886_v34 }
 0x603   :  { %v1635_v19 = vpop.f32.mrf.mxu0  ;;  %2115 = vmatprep.subr.bf16.mxu1 %v3505_v44 }
 0x604   :  { %v1636_v50 = vadd.f32 %v1635_v19, %v2883_v40  ;;  %v1684_v54 = vpack.c.bf16 %v1634_v59, %v1630_v29 }
 0x605   :  { %v1639_v55 = vpop.f32.mrf.mxu0 }
 0x606   :  { %v1685_v4 = vpack.c.bf16 %v1636_v50, %v1632_v0  ;;  %2131 = vmatpush1.bf16.msra.mxu1 %v3506_v35  ;;  %v1640_v35 = vadd.f32 %v1639_v55, %v2886_v34 }
 0x607   :  { %v1641_v32 = vpop.f32.mrf.mxu0  ;;  %2116 = vmatprep.subr.bf16.mxu1 %v3507_v46 }
 0x608   :  { %1756 = vmatprep.mubr.bf16.mxu1 %v1685_v4  ;;  %v1642_v2 = vadd.f32 %v1641_v32, %v2883_v40 }
 0x609   :  { %v1643_v57 = vpop.f32.mrf.mxu0  ;;  %1757 = vmatmul.mubr.bf16.gmra.mxu1 %v1684_v54 }
 0x60a   :  { %2132 = vmatpush1.bf16.msra.mxu1 %v3508_v13  ;;  %v1644_v44 = vadd.f32 %v1643_v57, %v2886_v34 }
 0x60b   :  { %v1645_v27 = vpop.f32.mrf.mxu0  ;;  %2117 = vmatprep.subr.bf16.mxu1 %v3509_v23 }
 0x60c   :  { %v1646_v61 = vadd.f32 %v1645_v27, %v2883_v40  ;;  %v1686_v46 = vpack.c.bf16 %v1644_v44, %v1640_v35 }
 0x60d   :  { %v1649_v8 = vpop.f32.mrf.mxu0 }
 0x60e   :  { %v1687_v30 = vpack.c.bf16 %v1646_v61, %v1642_v2  ;;  %2133 = vmatpush1.bf16.msra.mxu1 %v3510_v3  ;;  %v1650_v3 = vadd.f32 %v1649_v8, %v2886_v34 }
 0x60f   :  { %v1651_v17 = vpop.f32.mrf.mxu0  ;;  %2118 = vmatprep.subr.bf16.mxu1 %v3511_v48 }
 0x610   :  { %1766 = vmatprep.mubr.bf16.mxu1 %v1687_v30  ;;  %v1652_v58 = vadd.f32 %v1651_v17, %v2883_v40 }
 0x611   :  { %v1653_v13 = vpop.f32.mrf.mxu0  ;;  %1767 = vmatmul.mubr.bf16.gmra.mxu1 %v1686_v46 }
 0x612   :  { %2134 = vmatpush2.bf16.msra.mxu1 %v3512_v53  ;;  %v1654_v23 = vadd.f32 %v1653_v13, %v2886_v34 }
 0x613   :  { %v1655_v36 = vpop.f32.mrf.mxu0  ;;  %2119 = vmatprep.subr.bf16.mxu1 %v3513_v15 }
 0x614   :  { %v1656_v56 = vadd.f32 %v1655_v36, %v2883_v40  ;;  %v1688_v48 = vpack.c.bf16 %v1654_v23, %v1650_v3 }
 0x615   :  { %v1659_v9 = vpop.f32.mrf.mxu0 }
 0x616   :  { %v1689_v49 = vpack.c.bf16 %v1656_v56, %v1652_v58  ;;  %2135 = vmatpush2.bf16.msra.mxu1 %v3514_v25  ;;  %v1660_v25 = vadd.f32 %v1659_v9, %v2886_v34 }
 0x617   :  { %v1661_v26 = vpop.f32.mrf.mxu0  ;;  %2120 = vmatprep.subr.bf16.mxu1 %v3515_v41 }
 0x618   :  { %1776 = vmatprep.mubr.bf16.mxu1 %v1689_v49  ;;  %v1662_v10 = vadd.f32 %v1661_v26, %v2883_v40 }
 0x619   :  { %v1663_v53 = vpop.f32.mrf.mxu0  ;;  %1777 = vmatmul.mubr.bf16.gmra.mxu1 %v1688_v48 }
 0x61a   :  { %2136 = vmatpush2.bf16.msra.mxu1 %v3516_v28  ;;  %v1664_v15 = vadd.f32 %v1663_v53, %v2886_v34 }
 0x61b   :  { %v1665_v47 = vpop.f32.mrf.mxu0  ;;  %2121 = vmatprep.subr.bf16.mxu1 %v3104_v6 }
 0x61c   :  { %v1666_v39 = vadd.f32 %v1665_v47, %v2883_v40  ;;  %v1690_v41 = vpack.c.bf16 %v1664_v15, %v1660_v25 }
 0x61d   :  { %v1669_v33 = vpop.f32.mrf.mxu0 }
 0x61e   :  { %v1691_v42 = vpack.c.bf16 %v1666_v39, %v1662_v10  ;;  %2137 = vmatpush2.bf16.msra.mxu1 %v3107_v12  ;;  %v1670_v12 = vadd.f32 %v1669_v33, %v2886_v34 }
 0x61f   :  { %v1671_v18 = vpop.f32.mrf.mxu0  ;;  %2122 = vmatprep.subr.bf16.mxu1 %v3517_v38 }
 0x620   :  { %1786 = vmatprep.mubr.bf16.mxu1 %v1691_v42  ;;  %v1672_v60 = vadd.f32 %v1671_v18, %v2883_v40 }
 0x621   :  { %v1673_v28 = vpop.f32.mrf.mxu0  ;;  %1787 = vmatmul.mubr.bf16.gmra.mxu1 %v1690_v41 }
 0x622   :  { %2138 = vmatpush2.bf16.msra.mxu1 %v3117_v14  ;;  %v1674_v6 = vadd.f32 %v1673_v28, %v2886_v34 }
 0x623   :  { %v1675_v24 = vpop.f32.mrf.mxu0  ;;  %2123 = vmatprep.subr.bf16.mxu1 %v3250_v5 }
 0x624   :  { %v1676_v51 = vadd.f32 %v1675_v24, %v2883_v40  ;;  %v1692_v38 = vpack.c.bf16 %v1674_v6, %v1670_v12 }
 0x626   :  { %v1693_v52 = vpack.c.bf16 %v1676_v51, %v1672_v60  ;;  %2139 = vmatpush2.bf16.msra.mxu1 %v3253_v37 }
 0x627   :  { %2124 = vmatprep.subr.bf16.mxu1 %v3256_v62 }
 0x628   :  { %1796 = vmatprep.mubr.bf16.mxu1 %v1693_v52 }
 0x629   :  { %1797 = vmatmul.mubr.bf16.gmra.mxu1 %v1692_v38 }
 0x62a   :  { %2140 = vmatpush2.bf16.msra.mxu1 %v3259_v1 }
 0x62b   :  { %2125 = vmatprep.subr.bf16.mxu1 %v3262_v63 }
 0x62e   :  { %2141 = vmatpush2.bf16.msra.mxu1 %v3265_v21 }
 0x6b1   :  { %v1728_v14 = vpop.f32.mrf.mxu1 }
 0x6b2   :  { %v1729_v37 = vadd.f32 %v1728_v14, %v2813_v22 }
 0x6b3   :  { %v1730_v5 = vpop.f32.mrf.mxu1 }
 0x6b4   :  { %v1731_v43 = vadd.f32 %v1730_v5, %v2810_v20  ;;  %v1807_v19 = vmax.f32 %v1729_v37, 0.0 }
 0x6b5   :  { %v1732_v7 = vpop.f32.mrf.mxu1 }
 0x6b6   :  { %v1733_v45 = vadd.f32 %v1732_v7, %v2813_v22  ;;  %v1808_v59 = vmax.f32 %v1731_v43, 0.0 }
 0x6b7   :  { %v1734_v11 = vpop.f32.mrf.mxu1 }
 0x6b8   :  { %v1735_v62 = vadd.f32 %v1734_v11, %v2810_v20  ;;  %v1809_v31 = vmax.f32 %v1733_v45, 0.0 }
 0x6b9   :  { %v1738_v16 = vpop.f32.mrf.mxu1 }
 0x6ba   :  { %v1810_v1 = vmax.f32 %v1735_v62, 0.0  ;;  %v1839_v21 = vpack.c.bf16 %v1809_v31, %v1807_v19  ;;  %v1739_v4 = vadd.f32 %v1738_v16, %v2813_v22 }
 0x6bb   :  { %v1740_v63 = vpop.f32.mrf.mxu1 }
 0x6bc   :  { %v1840_v0 = vpack.c.bf16 %v1810_v1, %v1808_v59  ;;  %v1741_v29 = vadd.f32 %v1740_v63, %v2810_v20  ;;  %v1811_v61 = vmax.f32 %v1739_v4, 0.0 }
 0x6bd   :  { %v1742_v50 = vpop.f32.mrf.mxu1 }
 0x6be   :  { %v1743_v55 = vadd.f32 %v1742_v50, %v2813_v22  ;;  %1887 = vmatprep.mubr.bf16.mxu0 %v1840_v0  ;;  %v1812_v27 = vmax.f32 %v1741_v29, 0.0 }
 0x6bf   :  { %v1744_v54 = vpop.f32.mrf.mxu1  ;;  %1888 = vmatmul.mubr.bf16.vlgmr.msra.gmra.mxu0 %v1839_v21 }
 0x6c0   :  { %v1745_v32 = vadd.f32 %v1744_v54, %v2810_v20  ;;  %v1813_v57 = vmax.f32 %v1743_v55, 0.0 }
 0x6c1   :  { %v1748_v44 = vpop.f32.mrf.mxu1 }
 0x6c2   :  { %v1814_v2 = vmax.f32 %v1745_v32, 0.0  ;;  %v1841_v30 = vpack.c.bf16 %v1813_v57, %v1811_v61  ;;  %v1749_v23 = vadd.f32 %v1748_v44, %v2813_v22 }
 0x6c3   :  { %v1750_v35 = vpop.f32.mrf.mxu1 }
 0x6c4   :  { %v1842_v8 = vpack.c.bf16 %v1814_v2, %v1812_v27  ;;  %v1751_v17 = vadd.f32 %v1750_v35, %v2810_v20  ;;  %v1815_v48 = vmax.f32 %v1749_v23, 0.0 }
 0x6c5   :  { %v1752_v46 = vpop.f32.mrf.mxu1 }
 0x6c6   :  { %v1753_v13 = vadd.f32 %v1752_v46, %v2813_v22  ;;  %1897 = vmatprep.mubr.bf16.mxu0 %v1842_v8  ;;  %v1816_v9 = vmax.f32 %v1751_v17, 0.0 }
 0x6c7   :  { %v1754_v36 = vpop.f32.mrf.mxu1  ;;  %1898 = vmatmul.mubr.bf16.gmra.mxu0 %v1841_v30 }
 0x6c8   :  { %v1755_v58 = vadd.f32 %v1754_v36, %v2810_v20  ;;  %v1817_v56 = vmax.f32 %v1753_v13, 0.0 }
 0x6c9   :  { %v1758_v3 = vpop.f32.mrf.mxu1 }
 0x6ca   :  { %v1818_v49 = vmax.f32 %v1755_v58, 0.0  ;;  %v1843_v15 = vpack.c.bf16 %v1817_v56, %v1815_v48  ;;  %v1759_v25 = vadd.f32 %v1758_v3, %v2813_v22 }
 0x6cb   :  { %v1760_v26 = vpop.f32.mrf.mxu1 }
 0x6cc   :  { %v1844_v53 = vpack.c.bf16 %v1818_v49, %v1816_v9  ;;  %v1761_v10 = vadd.f32 %v1760_v26, %v2810_v20  ;;  %v1819_v24 = vmax.f32 %v1759_v25, 0.0 }
 0x6cd   :  { %v1762_v47 = vpop.f32.mrf.mxu1 }
 0x6ce   :  { %v1763_v39 = vadd.f32 %v1762_v47, %v2813_v22  ;;  %1907 = vmatprep.mubr.bf16.mxu0 %v1844_v53  ;;  %v1820_v28 = vmax.f32 %v1761_v10, 0.0 }
 0x6cf   :  { %v1764_v33 = vpop.f32.mrf.mxu1  ;;  %1908 = vmatmul.mubr.bf16.gmra.mxu0 %v1843_v15 }
 0x6d0   :  { %v1765_v42 = vadd.f32 %v1764_v33, %v2810_v20  ;;  %v1821_v41 = vmax.f32 %v1763_v39, 0.0 }
 0x6d1   :  { %v1768_v18 = vpop.f32.mrf.mxu1 }
 0x6d2   :  { %v1822_v6 = vmax.f32 %v1765_v42, 0.0  ;;  %v1845_v12 = vpack.c.bf16 %v1821_v41, %v1819_v24  ;;  %v1769_v5 = vadd.f32 %v1768_v18, %v2813_v22 }
 0x6d3   :  { %v1770_v60 = vpop.f32.mrf.mxu1 }
 0x6d4   :  { %v1846_v51 = vpack.c.bf16 %v1822_v6, %v1820_v28  ;;  %v1771_v38 = vadd.f32 %v1770_v60, %v2810_v20  ;;  %v1823_v31 = vmax.f32 %v1769_v5, 0.0 }
 0x6d5   :  { %v1772_v52 = vpop.f32.mrf.mxu1 }
 0x6d6   :  { %v1773_v14 = vadd.f32 %v1772_v52, %v2813_v22  ;;  %1917 = vmatprep.mubr.bf16.mxu0 %v1846_v51  ;;  %v1824_v11 = vmax.f32 %v1771_v38, 0.0 }
 0x6d7   :  { %v1774_v7 = vpop.f32.mrf.mxu1  ;;  %1918 = vmatmul.mubr.bf16.gmra.mxu0 %v1845_v12 }
 0x6d8   :  { %v1775_v43 = vadd.f32 %v1774_v7, %v2810_v20  ;;  %v1825_v45 = vmax.f32 %v1773_v14, 0.0 }
 0x6d9   :  { %v1778_v37 = vpop.f32.mrf.mxu1 }
 0x6da   :  { %v1826_v62 = vmax.f32 %v1775_v43, 0.0  ;;  %v1847_v1 = vpack.c.bf16 %v1825_v45, %v1823_v31  ;;  %v1779_v21 = vadd.f32 %v1778_v37, %v2813_v22 }
 0x6db   :  { %v1780_v16 = vpop.f32.mrf.mxu1 }
 0x6dc   :  { %v1848_v59 = vpack.c.bf16 %v1826_v62, %v1824_v11  ;;  %v1781_v63 = vadd.f32 %v1780_v16, %v2810_v20  ;;  %v1827_v57 = vmax.f32 %v1779_v21, 0.0 }
 0x6dd   :  { %v1782_v19 = vpop.f32.mrf.mxu1 }
 0x6de   :  { %v1783_v0 = vadd.f32 %v1782_v19, %v2813_v22  ;;  %1927 = vmatprep.mubr.bf16.mxu0 %v1848_v59  ;;  %v1828_v54 = vmax.f32 %v1781_v63, 0.0 }
 0x6df   :  { %v1784_v50 = vpop.f32.mrf.mxu1  ;;  %1928 = vmatmul.mubr.bf16.gmra.mxu0 %v1847_v1 }
 0x6e0   :  { %v1785_v29 = vadd.f32 %v1784_v50, %v2810_v20  ;;  %v1829_v55 = vmax.f32 %v1783_v0, 0.0 }
 0x6e1   :  { %v1788_v4 = vpop.f32.mrf.mxu1 }
 0x6e2   :  { %v1830_v32 = vmax.f32 %v1785_v29, 0.0  ;;  %v1849_v2 = vpack.c.bf16 %v1829_v55, %v1827_v57  ;;  %v1789_v30 = vadd.f32 %v1788_v4, %v2813_v22 }
 0x6e3   :  { %v1790_v44 = vpop.f32.mrf.mxu1 }
 0x6e4   :  { %v1850_v27 = vpack.c.bf16 %v1830_v32, %v1828_v54  ;;  %v1791_v35 = vadd.f32 %v1790_v44, %v2810_v20  ;;  %v1831_v56 = vmax.f32 %v1789_v30, 0.0 }
 0x6e5   :  { %v1792_v61 = vpop.f32.mrf.mxu1 }
 0x6e6   :  { %v1793_v8 = vadd.f32 %v1792_v61, %v2813_v22  ;;  %1937 = vmatprep.mubr.bf16.mxu0 %v1850_v27  ;;  %v1832_v36 = vmax.f32 %v1791_v35, 0.0 }
 0x6e7   :  { %v1794_v46 = vpop.f32.mrf.mxu1  ;;  %1938 = vmatmul.mubr.bf16.gmra.mxu0 %v1849_v2 }
 0x6e8   :  { %v1795_v17 = vadd.f32 %v1794_v46, %v2810_v20  ;;  %v1833_v13 = vmax.f32 %v1793_v8, 0.0 }
 0x6e9   :  { %v1798_v23 = vpop.f32.mrf.mxu1 }
 0x6ea   :  { %v1834_v58 = vmax.f32 %v1795_v17, 0.0  ;;  %v1851_v49 = vpack.c.bf16 %v1833_v13, %v1831_v56  ;;  %v1799_v15 = vadd.f32 %v1798_v23, %v2813_v22 }
 0x6eb   :  { %v1800_v3 = vpop.f32.mrf.mxu1 }
 0x6ec   :  { %v1852_v9 = vpack.c.bf16 %v1834_v58, %v1832_v36  ;;  %v1801_v26 = vadd.f32 %v1800_v3, %v2810_v20  ;;  %v1835_v42 = vmax.f32 %v1799_v15, 0.0 }
 0x6ed   :  { %v1802_v48 = vpop.f32.mrf.mxu1 }
 0x6ee   :  { %v1803_v53 = vadd.f32 %v1802_v48, %v2813_v22  ;;  %1947 = vmatprep.mubr.bf16.mxu1 %v1852_v9  ;;  %v1836_v25 = vmax.f32 %v1801_v26, 0.0 }
 0x6ef   :  { %v1804_v47 = vpop.f32.mrf.mxu1  ;;  %1948 = vmatmul.mubr.bf16.vlgmr.msra.gmra.mxu1 %v1851_v49 }
 0x6f0   :  { %v1805_v10 = vadd.f32 %v1804_v47, %v2810_v20  ;;  %v1837_v39 = vmax.f32 %v1803_v53, 0.0 }
 0x6f2   :  { %v1838_v33 = vmax.f32 %v1805_v10, 0.0  ;;  %v1853_v18 = vpack.c.bf16 %v1837_v39, %v1835_v42 }
 0x6f4   :  { %v1854_v41 = vpack.c.bf16 %v1838_v33, %v1836_v25 }
 0x6f6   :  { %1957 = vmatprep.mubr.bf16.mxu1 %v1854_v41 }
 0x6f7   :  { %1958 = vmatmul.mubr.bf16.gmra.mxu1 %v1853_v18 }
 0x77f   :  { %v1889_v28 = vpop.f32.mrf.mxu0 }
 0x780   :  { %v1890_v6 = vadd.f32 %v1889_v28, %v2886_v34 }
 0x781   :  { %v1891_v24 = vpop.f32.mrf.mxu0 }
 0x782   :  { %1971 = vst [vmem:[#allocation10] sm:$0xff] %v1890_v6  ;;  %v1892_v60 = vadd.f32 %v1891_v24, %v2883_v40 }
 0x783   :  { %v1893_v22 = vpop.f32.mrf.mxu0 }
 0x784   :  { %1972 = vst [vmem:[#allocation10 + $0x8] sm:$0xff] %v1892_v60  ;;  %v1894_v51 = vadd.f32 %v1893_v22, %v2886_v34 }
 0x785   :  { %v1895_v20 = vpop.f32.mrf.mxu0 }
 0x786   :  { %1973 = vst [vmem:[#allocation10 + $0x10] sm:$0xff] %v1894_v51  ;;  %v1896_v12 = vadd.f32 %v1895_v20, %v2883_v40 }
 0x787   :  { %v1899_v52 = vpop.f32.mrf.mxu0 }
 0x788   :  { %1974 = vst [vmem:[#allocation10 + $0x18] sm:$0xff] %v1896_v12  ;;  %v1900_v38 = vadd.f32 %v1899_v52, %v2886_v34 }
 0x789   :  { %v1901_v14 = vpop.f32.mrf.mxu0 }
 0x78a   :  { %1975 = vst [vmem:[#allocation10 + $0x20] sm:$0xff] %v1900_v38  ;;  %v1902_v5 = vadd.f32 %v1901_v14, %v2883_v40 }
 0x78b   :  { %v1903_v7 = vpop.f32.mrf.mxu0 }
 0x78c   :  { %1976 = vst [vmem:[#allocation10 + $0x28] sm:$0xff] %v1902_v5  ;;  %v1904_v43 = vadd.f32 %v1903_v7, %v2886_v34 }
 0x78d   :  { %v1905_v45 = vpop.f32.mrf.mxu0 }
 0x78e   :  { %1977 = vst [vmem:[#allocation10 + $0x30] sm:$0xff] %v1904_v43  ;;  %v1906_v37 = vadd.f32 %v1905_v45, %v2883_v40 }
 0x78f   :  { %v1909_v11 = vpop.f32.mrf.mxu0 }
 0x790   :  { %1978 = vst [vmem:[#allocation10 + $0x38] sm:$0xff] %v1906_v37  ;;  %v1910_v62 = vadd.f32 %v1909_v11, %v2886_v34 }
 0x791   :  { %v1911_v31 = vpop.f32.mrf.mxu0 }
 0x792   :  { %1979 = vst [vmem:[#allocation10 + $0x40] sm:$0xff] %v1910_v62  ;;  %v1912_v16 = vadd.f32 %v1911_v31, %v2883_v40 }
 0x793   :  { %v1913_v59 = vpop.f32.mrf.mxu0 }
 0x794   :  { %1980 = vst [vmem:[#allocation10 + $0x48] sm:$0xff] %v1912_v16  ;;  %v1914_v1 = vadd.f32 %v1913_v59, %v2886_v34 }
 0x795   :  { %v1915_v19 = vpop.f32.mrf.mxu0 }
 0x796   :  { %1981 = vst [vmem:[#allocation10 + $0x50] sm:$0xff] %v1914_v1  ;;  %v1916_v63 = vadd.f32 %v1915_v19, %v2883_v40 }
 0x797   :  { %v1919_v0 = vpop.f32.mrf.mxu0 }
 0x798   :  { %1982 = vst [vmem:[#allocation10 + $0x58] sm:$0xff] %v1916_v63  ;;  %v1920_v21 = vadd.f32 %v1919_v0, %v2886_v34 }
 0x799   :  { %v1921_v50 = vpop.f32.mrf.mxu0 }
 0x79a   :  { %1983 = vst [vmem:[#allocation10 + $0x60] sm:$0xff] %v1920_v21  ;;  %v1922_v29 = vadd.f32 %v1921_v50, %v2883_v40 }
 0x79b   :  { %v1923_v55 = vpop.f32.mrf.mxu0 }
 0x79c   :  { %1984 = vst [vmem:[#allocation10 + $0x68] sm:$0xff] %v1922_v29  ;;  %v1924_v4 = vadd.f32 %v1923_v55, %v2886_v34 }
 0x79d   :  { %v1925_v54 = vpop.f32.mrf.mxu0 }
 0x79e   :  { %1985 = vst [vmem:[#allocation10 + $0x70] sm:$0xff] %v1924_v4  ;;  %v1926_v32 = vadd.f32 %v1925_v54, %v2883_v40 }
 0x79f   :  { %v1929_v57 = vpop.f32.mrf.mxu0 }
 0x7a0   :  { %1986 = vst [vmem:[#allocation10 + $0x78] sm:$0xff] %v1926_v32  ;;  %v1930_v44 = vadd.f32 %v1929_v57, %v2886_v34 }
 0x7a1   :  { %v1931_v27 = vpop.f32.mrf.mxu0 }
 0x7a2   :  { %1987 = vst [vmem:[#allocation10 + $0x80] sm:$0xff] %v1930_v44  ;;  %v1932_v2 = vadd.f32 %v1931_v27, %v2883_v40 }
 0x7a3   :  { %v1933_v61 = vpop.f32.mrf.mxu0 }
 0x7a4   :  { %1988 = vst [vmem:[#allocation10 + $0x88] sm:$0xff] %v1932_v2  ;;  %v1934_v35 = vadd.f32 %v1933_v61, %v2886_v34 }
 0x7a5   :  { %v1935_v8 = vpop.f32.mrf.mxu0 }
 0x7a6   :  { %1989 = vst [vmem:[#allocation10 + $0x90] sm:$0xff] %v1934_v35  ;;  %v1936_v30 = vadd.f32 %v1935_v8, %v2883_v40 }
 0x7a7   :  { %v1939_v46 = vpop.f32.mrf.mxu0 }
 0x7a8   :  { %1990 = vst [vmem:[#allocation10 + $0x98] sm:$0xff] %v1936_v30  ;;  %v1940_v17 = vadd.f32 %v1939_v46, %v2886_v34 }
 0x7a9   :  { %v1941_v13 = vpop.f32.mrf.mxu0 }
 0x7aa   :  { %1991 = vst [vmem:[#allocation10 + $0xa0] sm:$0xff] %v1940_v17  ;;  %v1942_v23 = vadd.f32 %v1941_v13, %v2883_v40 }
 0x7ab   :  { %v1943_v36 = vpop.f32.mrf.mxu0 }
 0x7ac   :  { %1992 = vst [vmem:[#allocation10 + $0xa8] sm:$0xff] %v1942_v23  ;;  %v1944_v58 = vadd.f32 %v1943_v36, %v2886_v34 }
 0x7ad   :  { %v1945_v56 = vpop.f32.mrf.mxu0 }
 0x7ae   :  { %1993 = vst [vmem:[#allocation10 + $0xb0] sm:$0xff] %v1944_v58  ;;  %v1946_v3 = vadd.f32 %v1945_v56, %v2883_v40 }
 0x7af   :  { %v1949_v9 = vpop.f32.mrf.mxu1 }
 0x7b0   :  { %1994 = vst [vmem:[#allocation10 + $0xb8] sm:$0xff] %v1946_v3  ;;  %v1950_v49 = vadd.f32 %v1949_v9, %v2886_v34 }
 0x7b1   :  { %v1951_v48 = vpop.f32.mrf.mxu1 }
 0x7b2   :  { %1995 = vst [vmem:[#allocation10 + $0xc0] sm:$0xff] %v1950_v49  ;;  %v1952_v26 = vadd.f32 %v1951_v48, %v2883_v40 }
 0x7b3   :  { %v1953_v53 = vpop.f32.mrf.mxu1 }
 0x7b4   :  { %1996 = vst [vmem:[#allocation10 + $0xc8] sm:$0xff] %v1952_v26  ;;  %v1954_v15 = vadd.f32 %v1953_v53, %v2886_v34 }
 0x7b5   :  { %v1955_v47 = vpop.f32.mrf.mxu1 }
 0x7b6   :  { %1997 = vst [vmem:[#allocation10 + $0xd0] sm:$0xff] %v1954_v15  ;;  %v1956_v10 = vadd.f32 %v1955_v47, %v2883_v40 }
 0x7b7   :  { %v1959_v39 = vpop.f32.mrf.mxu1 }
 0x7b8   :  { %1998 = vst [vmem:[#allocation10 + $0xd8] sm:$0xff] %v1956_v10  ;;  %v1960_v25 = vadd.f32 %v1959_v39, %v2886_v34 }
 0x7b9   :  { %v1961_v33 = vpop.f32.mrf.mxu1 }
 0x7ba   :  { %1999 = vst [vmem:[#allocation10 + $0xe0] sm:$0xff] %v1960_v25  ;;  %v1962_v42 = vadd.f32 %v1961_v33, %v2883_v40 }
 0x7bb   :  { %v1963_v41 = vpop.f32.mrf.mxu1 }
 0x7bc   :  { %2000 = vst [vmem:[#allocation10 + $0xe8] sm:$0xff] %v1962_v42  ;;  %v1964_v18 = vadd.f32 %v1963_v41, %v2886_v34 }
 0x7bd   :  { %v1965_v28 = vpop.f32.mrf.mxu1 }
 0x7be   :  { %2001 = vst [vmem:[#allocation10 + $0xf0] sm:$0xff] %v1964_v18  ;;  %v1966_v6 = vadd.f32 %v1965_v28, %v2883_v40 }
 0x7c0   :  { %2002 = vst [vmem:[#allocation10 + $0xf8] sm:$0xff] %v1966_v6 }
 0x7c1   :  { %2437 = shalt.err (!%p2434_p10)
}
 0x7c2   :  { %s2464_s27 = smov 256   ;;  %s2465_s28 = smov 16  }
 0x7c3   :  { %2014 = dma.vmem_to_hbm [thread:$0]  %s2009_s25, 4096, %s3405_s7, [#allocation4], %s2464_s27, %s2464_s27, %s2465_s28  }
 0x7c4   :  { %2452 = dma.done.wait [#allocation4], 4096  }
 0x7c5   :  { %2453 = vsyncadd [#allocation4], 4294963200 }
 0x7c6   :  { %2018 = vsyncpa [#allocation3], 1 }
 0x7c7   :  { %2019 = vsyncpa [#allocation6], 1 }
 0x7c8   :  { %2020 = vsyncpa [#allocation9], 1 }
 0x7c9   :  { %2021 = vsyncpa [#allocation4], 1 }

</bundles_post_ra>
